<compile_context>
chip_gen: v7x
topology: tpu7x:2x2x1
jax: 0.10.0
libtpu: 0.0.40
codegen_flags: <defaults>
</compile_context>

<pallas_src>
import math

import jax
import jax.numpy as jnp
from jax.experimental import pallas as pl
from jax.experimental.pallas import tpu as pltpu

# ---------------- config (small synthetic BERT) ----------------
VOCAB = 64
MAX_POS = 32
HIDDEN = 32
NUM_HEADS = 2
HEAD_DIM = HIDDEN // NUM_HEADS
INTERMEDIATE = 64
NUM_LAYERS = 2
TAG_SIZE = 5
LN_EPS = 1e-12

BATCH = 2
SEQ = 16

NEG_INF = -1e9
ATTN_SCALE = 1.0 / math.sqrt(HEAD_DIM)

OUT_SUB, OUT_LANE = 8, 128  # padded, lane-dense output block per batch element

# packed bf16 per-layer weight slab (L, H, 192): lanes = [Wq|Wk|Wv | Wo | Wi]
W_QKV_OFF, W_QKV_LEN = 0, 3 * HIDDEN
W_O_OFF = 3 * HIDDEN
W_I_OFF = 4 * HIDDEN
W_LANE = 4 * HIDDEN + INTERMEDIATE  # 192

# packed f32 per-layer params (L, 352): [bq|bk|bv | bo | g1 | b1 | bi | bf | g2 | b2]
OFF_BQKV = 0
OFF_BO = 96
OFF_G1 = 128
OFF_BE1 = 160
OFF_BI = 192
OFF_BF = 256
OFF_G2 = 288
OFF_BE2 = 320
P_LAYER_LEN = 352

# packed f32 global params (1, 101): [emb_ln_g | emb_ln_b | fc_b1 | fc_b2]
OFF_EG = 0
OFF_EB = 32
OFF_FB1 = 64
OFF_FB2 = 96
P_GLOB_LEN = 101


# ---------------- in-kernel helpers ----------------
def _gelu(x):
    # TODO(synk): HF BERT uses exact erf-GELU; tanh approximation used here.
    return 0.5 * x * (1.0 + jnp.tanh(0.7978845608028654 * (x + 0.044715 * x * x * x)))


def _layernorm(x, g, b):
    mu = jnp.mean(x, axis=-1, keepdims=True)
    var = jnp.mean(jnp.square(x - mu), axis=-1, keepdims=True)
    return (x - mu) * jax.lax.rsqrt(var + LN_EPS) * g + b


def _split_heads(x):  # (S, H) -> (NH, S, Dh); head-major static lane slices
    return jnp.stack(
        [x[:, h * HEAD_DIM:(h + 1) * HEAD_DIM] for h in range(NUM_HEADS)], axis=0)


# ---------------- fused per-batch-element kernel (grid over batch) ----------------
def model_kernel(emb_ref, mask_ref, wl_ref, wf_ref, wcls_ref,
                 plyr_ref, pglb_ref, o_ref):
    S, H, I = SEQ, HIDDEN, INTERMEDIATE
    bf16, f32 = jnp.bfloat16, jnp.float32

    mask = mask_ref[...]                              # (1, S) f32, 1.0 = keep token
    add_mask = (1.0 - mask) * NEG_INF                 # additive key mask (broadcasts)

    # ---- embedding layernorm (word + pos + type summed in glue) ----
    h = _layernorm(emb_ref[...],
                   pglb_ref[0:1, OFF_EG:OFF_EG + H],
                   pglb_ref[0:1, OFF_EB:OFF_EB + H])  # (S, H) f32

    # ---- transformer layers, weights fully resident in VMEM ----
    for l in range(NUM_LAYERS):
        def lp(off, n, _l=l):                         # (1, n) f32 per-layer param slice
            return plyr_ref[_l:_l + 1, off:off + n]

        # fused QKV: one (S, H) x (H, 3H) matmul per layer
        qkv = jnp.dot(h.astype(bf16),
                      wl_ref[l, :, W_QKV_OFF:W_QKV_OFF + W_QKV_LEN],
                      preferred_element_type=f32) + lp(OFF_BQKV, 3 * H)   # (S, 3H)

        q = _split_heads(qkv[:, 0:H]).astype(bf16)            # (NH, S, Dh)
        k = _split_heads(qkv[:, H:2 * H]).astype(bf16)
        v = _split_heads(qkv[:, 2 * H:3 * H]).astype(bf16)

        # head-batched attention: single softmax stream per layer
        s = jnp.einsum('hqd,hkd->hqk', q, k,
                       preferred_element_type=f32) * ATTN_SCALE + add_mask  # (NH,S,S)
        s = s - jnp.max(s, axis=-1, keepdims=True)
        p = jnp.exp(s)
        p = p * pl.reciprocal(jnp.sum(p, axis=-1, keepdims=True), approx=True)
        ctx = jnp.einsum('hqk,hkd->hqd', p.astype(bf16), v,
                         preferred_element_type=f32)                         # (NH,S,Dh)
        ctx = jnp.concatenate([ctx[hh] for hh in range(NUM_HEADS)], axis=-1)  # (S, H)

        # single full-width output projection + residual + LN
        attn = jnp.dot(ctx.astype(bf16), wl_ref[l, :, W_O_OFF:W_O_OFF + H],
                       preferred_element_type=f32) + lp(OFF_BO, H)
        h = _layernorm(attn + h, lp(OFF_G1, H), lp(OFF_BE1, H))

        # FFN + residual + LN
        inter = _gelu(jnp.dot(h.astype(bf16), wl_ref[l, :, W_I_OFF:W_I_OFF + I],
                              preferred_element_type=f32) + lp(OFF_BI, I))
        ffn = jnp.dot(inter.astype(bf16), wf_ref[l],
                      preferred_element_type=f32) + lp(OFF_BF, H)
        h = _layernorm(ffn + h, lp(OFF_G2, H), lp(OFF_BE2, H))

    # ---- masked-mean pooling over sequence (exact divide, zero-mask guard) ----
    pooled = jnp.dot(mask, h, preferred_element_type=f32)     # (1, H)
    denom = jnp.sum(mask, axis=-1, keepdims=True)             # (1, 1)
    pooled = pooled / jnp.maximum(denom, 1.0)

    # ---- classification head: Linear -> ReLU -> Linear -> Sigmoid ----
    z = jnp.maximum(
        jnp.dot(pooled.astype(bf16), wcls_ref[:, 0:H], preferred_element_type=f32)
        + pglb_ref[0:1, OFF_FB1:OFF_FB1 + H], 0.0)
    logits = (jnp.dot(z.astype(bf16), wcls_ref[:, H:H + TAG_SIZE],
                      preferred_element_type=f32)
              + pglb_ref[0:1, OFF_FB2:OFF_FB2 + TAG_SIZE])
    sig = jax.nn.sigmoid(logits)                              # (1, TAG_SIZE)

    # lane/sublane-dense HBM writeback: full (8, 128) block, result in corner
    o_ref[...] = jnp.zeros((OUT_SUB, OUT_LANE), f32)
    o_ref[0:1, 0:TAG_SIZE] = sig


# ---------------- host-side weight packing (layout plumbing, not compute) ----
def pack_params(params):
    lys = params["layers"]
    bfloat = jnp.bfloat16

    def st(name):
        return jnp.stack([layer[name] for layer in lys], axis=0)

    # one bf16 slab per layer: lanes [Wq | Wk | Wv | Wo | Wi] -> (L, H, 192)
    w_layer = jnp.concatenate(
        [st("wq"), st("wk"), st("wv"), st("wo"), st("wi")], axis=2).astype(bfloat)
    wf = st("wf").astype(bfloat)                              # (L, I, H)

    # one f32 vector per layer: matches OFF_* offsets above -> (L, 352)
    p_layer = jnp.concatenate(
        [st("bq"), st("bk"), st("bv"), st("bo"),
         st("ln1_g"), st("ln1_b"), st("bi"), st("bf"),
         st("ln2_g"), st("ln2_b")], axis=1).astype(jnp.float32)

    fc = params["fc"]
    w_cls = jnp.concatenate([fc["w1"], fc["w2"]], axis=1).astype(bfloat)  # (H, H+TAG)

    emb = params["embeddings"]
    p_glob = jnp.concatenate(
        [emb["ln_g"], emb["ln_b"], fc["b1"], fc["b2"]]).astype(jnp.float32)[None, :]

    return w_layer, wf, w_cls, p_layer, p_glob


# ---------------- forward: glue (gathers) + one pallas_call, grid over batch ----
def model_forward(params, input_ids, token_type_ids, attention_mask):
    B, S = input_ids.shape
    emb_p = params["embeddings"]
    # embedding gathers are glue (plain JAX)
    word = jnp.take(emb_p["word"], input_ids, axis=0)             # (B, S, H)
    pos = emb_p["pos"][:S][None, :, :]                            # (1, S, H)
    typ = jnp.take(emb_p["type"], token_type_ids, axis=0)         # (B, S, H)
    emb = (word + pos + typ).astype(jnp.float32)                  # (B, S, H)
    mask = attention_mask.astype(jnp.float32).reshape(B, 1, S)    # (B, 1, S)

    w_layer, wf, w_cls, p_layer, p_glob = pack_params(params)

    out = pl.pallas_call(
        model_kernel,
        grid=(B,),
        in_specs=[
            pl.BlockSpec((None, S, HIDDEN), lambda b: (b, 0, 0)),     # emb, per batch
            pl.BlockSpec((None, 1, S), lambda b: (b, 0, 0)),          # mask, per batch
            pl.BlockSpec(w_layer.shape, lambda b: (0, 0, 0)),         # weights resident
            pl.BlockSpec(wf.shape, lambda b: (0, 0, 0)),
            pl.BlockSpec(w_cls.shape, lambda b: (0, 0)),
            pl.BlockSpec(p_layer.shape, lambda b: (0, 0)),
            pl.BlockSpec(p_glob.shape, lambda b: (0, 0)),
        ],
        out_specs=pl.BlockSpec((None, OUT_SUB, OUT_LANE), lambda b: (b, 0, 0)),
        out_shape=jax.ShapeDtypeStruct((B, OUT_SUB, OUT_LANE), jnp.float32),
        compiler_params=pltpu.CompilerParams(dimension_semantics=("parallel",)),
    )(emb, mask, w_layer, wf, w_cls, p_layer, p_glob)

    return out[:, 0, :TAG_SIZE]                                   # (B, TAG_SIZE)


# ---------------- deterministic parameter init ----------------
def init_params(key):
    def dense(k, fan_in, fan_out):
        kw, kb = jax.random.split(k)
        w = jax.random.normal(kw, (fan_in, fan_out), jnp.float32) * 0.02
        b = jax.random.normal(kb, (fan_out,), jnp.float32) * 0.02
        return w, b

    keys = jax.random.split(key, 4 + NUM_LAYERS)
    k_word, k_pos, k_type, k_fc = keys[0], keys[1], keys[2], keys[3]
    params = {
        "embeddings": {
            "word": jax.random.normal(k_word, (VOCAB, HIDDEN), jnp.float32) * 0.02,
            "pos": jax.random.normal(k_pos, (MAX_POS, HIDDEN), jnp.float32) * 0.02,
            "type": jax.random.normal(k_type, (2, HIDDEN), jnp.float32) * 0.02,
            "ln_g": jnp.ones((HIDDEN,), jnp.float32),
            "ln_b": jnp.zeros((HIDDEN,), jnp.float32),
        },
        "layers": [],
    }
    for li in range(NUM_LAYERS):
        lk = jax.random.split(keys[4 + li], 6)
        wq, bq = dense(lk[0], HIDDEN, HIDDEN)
        wk, bk = dense(lk[1], HIDDEN, HIDDEN)
        wv, bv = dense(lk[2], HIDDEN, HIDDEN)
        wo, bo = dense(lk[3], HIDDEN, HIDDEN)
        wi, bi = dense(lk[4], HIDDEN, INTERMEDIATE)
        wf, bf = dense(lk[5], INTERMEDIATE, HIDDEN)
        params["layers"].append(dict(
            wq=wq, bq=bq, wk=wk, bk=bk, wv=wv, bv=bv, wo=wo, bo=bo,
            ln1_g=jnp.ones((HIDDEN,), jnp.float32), ln1_b=jnp.zeros((HIDDEN,), jnp.float32),
            wi=wi, bi=bi, wf=wf, bf=bf,
            ln2_g=jnp.ones((HIDDEN,), jnp.float32), ln2_b=jnp.zeros((HIDDEN,), jnp.float32),
        ))
    kfc1, kfc2 = jax.random.split(k_fc)
    w1, b1 = dense(kfc1, HIDDEN, HIDDEN)
    w2, b2 = dense(kfc2, HIDDEN, TAG_SIZE)
    params["fc"] = dict(w1=w1, b1=b1, w2=w2, b2=b2)
    return params


if __name__ == "__main__":
    key = jax.random.PRNGKey(0)
    kp, kid = jax.random.split(key)
    params = init_params(kp)

    input_ids = jax.random.randint(kid, (BATCH, SEQ), 0, VOCAB, dtype=jnp.int32)
    token_type_ids = jnp.zeros((BATCH, SEQ), jnp.int32)
    lengths = jnp.array([SEQ, 10], jnp.int32)
    attention_mask = (jnp.arange(SEQ)[None, :] < lengths[:, None]).astype(jnp.int32)

    fwd = jax.jit(model_forward)
    out = fwd(params, input_ids, token_type_ids, attention_mask)
    out = jax.block_until_ready(out)
    assert out.shape == (BATCH, TAG_SIZE)
    assert bool(jnp.all((out >= 0.0) & (out <= 1.0)))
    print("KERNEL_OK")
</pallas_src>

<mosaic_0001>
module attributes {stable_mosaic.version = 11 : i64} {
  func.func @model_kernel(%arg0: i32, %arg1: memref<1x16x32xf32, #tpu.memory_space<vmem>>, %arg2: memref<1x1x16xf32, #tpu.memory_space<vmem>>, %arg3: memref<2x32x192xbf16, #tpu.memory_space<vmem>>, %arg4: memref<2x64x32xbf16, #tpu.memory_space<vmem>>, %arg5: memref<32x37xbf16, #tpu.memory_space<vmem>>, %arg6: memref<2x352xf32, #tpu.memory_space<vmem>>, %arg7: memref<1x101xf32, #tpu.memory_space<vmem>>, %arg8: memref<1x8x128xf32, #tpu.memory_space<vmem>>) attributes {dimension_semantics = [#tpu.dimension_semantics<parallel>], iteration_bounds = array<i64: 2>, scalar_prefetch = 0 : i64, scratch_operands = 0 : i64, tpu.core_type = #tpu.core_type<tc>, window_params = [{transform_indices = @transform_0, window_bounds = array<i64: 1, 16, 32>}, {transform_indices = @transform_1, window_bounds = array<i64: 1, 1, 16>}, {pipeline_mode = #tpu.pipeline_mode<synchronous>, transform_indices = @transform_2, window_bounds = array<i64: 2, 32, 192>}, {pipeline_mode = #tpu.pipeline_mode<synchronous>, transform_indices = @transform_3, window_bounds = array<i64: 2, 64, 32>}, {pipeline_mode = #tpu.pipeline_mode<synchronous>, transform_indices = @transform_4, window_bounds = array<i64: 32, 37>}, {pipeline_mode = #tpu.pipeline_mode<synchronous>, transform_indices = @transform_5, window_bounds = array<i64: 2, 352>}, {pipeline_mode = #tpu.pipeline_mode<synchronous>, transform_indices = @transform_6, window_bounds = array<i64: 1, 101>}, {transform_indices = @transform_7, window_bounds = array<i64: 1, 8, 128>}]} {
    %c0 = arith.constant 0 : index
    %c0_0 = arith.constant 0 : index
    %c0_1 = arith.constant 0 : index
    %0 = vector.load %arg2[%c0, %c0_0, %c0_1] : memref<1x1x16xf32, #tpu.memory_space<vmem>>, vector<1x1x16xf32>
    %1 = vector.shape_cast %0 : vector<1x1x16xf32> to vector<1x16xf32>
    %cst = arith.constant 1.000000e+00 : f32
    %2 = vector.broadcast %cst : f32 to vector<1x16xf32>
    %3 = arith.subf %2, %1 : vector<1x16xf32>
    %cst_2 = arith.constant -1.000000e+09 : f32
    %4 = vector.broadcast %cst_2 : f32 to vector<1x16xf32>
    %5 = arith.mulf %3, %4 : vector<1x16xf32>
    %c0_3 = arith.constant 0 : index
    %c0_4 = arith.constant 0 : index
    %c0_5 = arith.constant 0 : index
    %6 = vector.load %arg1[%c0_3, %c0_4, %c0_5] : memref<1x16x32xf32, #tpu.memory_space<vmem>>, vector<1x16x32xf32>
    %7 = vector.shape_cast %6 : vector<1x16x32xf32> to vector<16x32xf32>
    %c0_6 = arith.constant 0 : index
    %c0_7 = arith.constant 0 : index
    %8 = vector.load %arg7[%c0_6, %c0_7] : memref<1x101xf32, #tpu.memory_space<vmem>>, vector<1x32xf32>
    %c0_8 = arith.constant 0 : index
    %c32 = arith.constant 32 : index
    %9 = vector.load %arg7[%c0_8, %c32] : memref<1x101xf32, #tpu.memory_space<vmem>>, vector<1x32xf32>
    %cst_9 = arith.constant dense<0.000000e+00> : vector<16xf32>
    %10 = vector.multi_reduction <add>, %7, %cst_9 [1] : vector<16x32xf32> to vector<16xf32>
    %11 = vector.shape_cast %10 : vector<16xf32> to vector<16x1xf32>
    %cst_10 = arith.constant 3.200000e+01 : f32
    %12 = vector.broadcast %cst_10 : f32 to vector<16x1xf32>
    %13 = arith.divf %11, %12 : vector<16x1xf32>
    %14 = vector.broadcast %13 : vector<16x1xf32> to vector<16x32xf32>
    %15 = arith.subf %7, %14 : vector<16x32xf32>
    %16 = arith.mulf %15, %15 : vector<16x32xf32>
    %cst_11 = arith.constant dense<0.000000e+00> : vector<16xf32>
    %17 = vector.multi_reduction <add>, %16, %cst_11 [1] : vector<16x32xf32> to vector<16xf32>
    %18 = vector.shape_cast %17 : vector<16xf32> to vector<16x1xf32>
    %cst_12 = arith.constant 3.200000e+01 : f32
    %19 = vector.broadcast %cst_12 : f32 to vector<16x1xf32>
    %20 = arith.divf %18, %19 : vector<16x1xf32>
    %21 = vector.broadcast %13 : vector<16x1xf32> to vector<16x32xf32>
    %22 = arith.subf %7, %21 : vector<16x32xf32>
    %cst_13 = arith.constant 9.99999996E-13 : f32
    %23 = vector.broadcast %cst_13 : f32 to vector<16x1xf32>
    %24 = arith.addf %20, %23 : vector<16x1xf32>
    %25 = math.rsqrt %24 : vector<16x1xf32>
    %26 = vector.broadcast %25 : vector<16x1xf32> to vector<16x32xf32>
    %27 = arith.mulf %22, %26 : vector<16x32xf32>
    %28 = vector.broadcast %8 : vector<1x32xf32> to vector<16x32xf32>
    %29 = arith.mulf %27, %28 : vector<16x32xf32>
    %30 = vector.broadcast %9 : vector<1x32xf32> to vector<16x32xf32>
    %31 = arith.addf %29, %30 : vector<16x32xf32>
    %32 = arith.truncf %31 : vector<16x32xf32> to vector<16x32xbf16>
    %c0_14 = arith.constant 0 : index
    %c0_15 = arith.constant 0 : index
    %c0_16 = arith.constant 0 : index
    %33 = vector.load %arg3[%c0_14, %c0_15, %c0_16] : memref<2x32x192xbf16, #tpu.memory_space<vmem>>, vector<1x32x96xbf16>
    %34 = vector.shape_cast %33 : vector<1x32x96xbf16> to vector<32x96xbf16>
    %cst_17 = arith.constant dense<0.000000e+00> : vector<16x96xf32>
    %35 = tpu.matmul %32, %34, %cst_17 {dimension_numbers = #tpu.dot_dimension_numbers<[1], [0], [0], [1], [0, 0, 1, 1], [], []>} : vector<16x32xbf16>, vector<32x96xbf16>, vector<16x96xf32> -> vector<16x96xf32>
    %c0_18 = arith.constant 0 : index
    %c0_19 = arith.constant 0 : index
    %36 = vector.load %arg6[%c0_18, %c0_19] : memref<2x352xf32, #tpu.memory_space<vmem>>, vector<1x96xf32>
    %37 = vector.broadcast %36 : vector<1x96xf32> to vector<16x96xf32>
    %38 = arith.addf %35, %37 : vector<16x96xf32>
    %39 = vector.extract_strided_slice %38 {offsets = [0, 0], sizes = [16, 32], strides = [1, 1]} : vector<16x96xf32> to vector<16x32xf32>
    %40 = vector.extract_strided_slice %39 {offsets = [0, 0], sizes = [16, 16], strides = [1, 1]} : vector<16x32xf32> to vector<16x16xf32>
    %41 = vector.extract_strided_slice %39 {offsets = [0, 16], sizes = [16, 16], strides = [1, 1]} : vector<16x32xf32> to vector<16x16xf32>
    %42 = vector.shape_cast %40 : vector<16x16xf32> to vector<1x16x16xf32>
    %43 = vector.shape_cast %41 : vector<16x16xf32> to vector<1x16x16xf32>
    %44 = tpu.concatenate %42, %43 in 0 : vector<1x16x16xf32>, vector<1x16x16xf32> -> vector<2x16x16xf32>
    %45 = arith.truncf %44 : vector<2x16x16xf32> to vector<2x16x16xbf16>
    %46 = vector.extract_strided_slice %38 {offsets = [0, 32], sizes = [16, 32], strides = [1, 1]} : vector<16x96xf32> to vector<16x32xf32>
    %47 = vector.extract_strided_slice %46 {offsets = [0, 0], sizes = [16, 16], strides = [1, 1]} : vector<16x32xf32> to vector<16x16xf32>
    %48 = vector.extract_strided_slice %46 {offsets = [0, 16], sizes = [16, 16], strides = [1, 1]} : vector<16x32xf32> to vector<16x16xf32>
    %49 = vector.shape_cast %47 : vector<16x16xf32> to vector<1x16x16xf32>
    %50 = vector.shape_cast %48 : vector<16x16xf32> to vector<1x16x16xf32>
    %51 = tpu.concatenate %49, %50 in 0 : vector<1x16x16xf32>, vector<1x16x16xf32> -> vector<2x16x16xf32>
    %52 = arith.truncf %51 : vector<2x16x16xf32> to vector<2x16x16xbf16>
    %53 = vector.extract_strided_slice %38 {offsets = [0, 64], sizes = [16, 32], strides = [1, 1]} : vector<16x96xf32> to vector<16x32xf32>
    %54 = vector.extract_strided_slice %53 {offsets = [0, 0], sizes = [16, 16], strides = [1, 1]} : vector<16x32xf32> to vector<16x16xf32>
    %55 = vector.extract_strided_slice %53 {offsets = [0, 16], sizes = [16, 16], strides = [1, 1]} : vector<16x32xf32> to vector<16x16xf32>
    %56 = vector.shape_cast %54 : vector<16x16xf32> to vector<1x16x16xf32>
    %57 = vector.shape_cast %55 : vector<16x16xf32> to vector<1x16x16xf32>
    %58 = tpu.concatenate %56, %57 in 0 : vector<1x16x16xf32>, vector<1x16x16xf32> -> vector<2x16x16xf32>
    %59 = arith.truncf %58 : vector<2x16x16xf32> to vector<2x16x16xbf16>
    "tpu.trace_start"() <{level = 10 : i32, message = "hqd,hkd->hqk"}> : () -> ()
    %cst_20 = arith.constant dense<0.000000e+00> : vector<2x16x16xf32>
    %60 = tpu.matmul %45, %52, %cst_20 {dimension_numbers = #tpu.dot_dimension_numbers<[2], [2], [1], [1], [0, 0, 0, 1, 1, 1], [0], [0]>} : vector<2x16x16xbf16>, vector<2x16x16xbf16>, vector<2x16x16xf32> -> vector<2x16x16xf32>
    "tpu.trace_stop"() : () -> ()
    %cst_21 = arith.constant 2.500000e-01 : f32
    %61 = vector.broadcast %cst_21 : f32 to vector<2x16x16xf32>
    %62 = arith.mulf %60, %61 : vector<2x16x16xf32>
    %63 = vector.shape_cast %5 : vector<1x16xf32> to vector<1x1x16xf32>
    %64 = vector.broadcast %63 : vector<1x1x16xf32> to vector<2x16x16xf32>
    %65 = arith.addf %62, %64 : vector<2x16x16xf32>
    %cst_22 = arith.constant dense<0xFF800000> : vector<2x16xf32>
    %66 = vector.multi_reduction <maximumf>, %65, %cst_22 [2] : vector<2x16x16xf32> to vector<2x16xf32>
    %67 = vector.shape_cast %66 : vector<2x16xf32> to vector<2x16x1xf32>
    %68 = vector.broadcast %67 : vector<2x16x1xf32> to vector<2x16x16xf32>
    %69 = arith.subf %65, %68 : vector<2x16x16xf32>
    %70 = math.exp %69 : vector<2x16x16xf32>
    %cst_23 = arith.constant dense<0.000000e+00> : vector<2x16xf32>
    %71 = vector.multi_reduction <add>, %70, %cst_23 [2] : vector<2x16x16xf32> to vector<2x16xf32>
    %72 = vector.shape_cast %71 : vector<2x16xf32> to vector<2x16x1xf32>
    %73 = tpu.reciprocal %72 {approx = true} : vector<2x16x1xf32> -> vector<2x16x1xf32>
    %74 = vector.broadcast %73 : vector<2x16x1xf32> to vector<2x16x16xf32>
    %75 = arith.mulf %70, %74 : vector<2x16x16xf32>
    %76 = arith.truncf %75 : vector<2x16x16xf32> to vector<2x16x16xbf16>
    "tpu.trace_start"() <{level = 10 : i32, message = "hqk,hkd->hqd"}> : () -> ()
    %cst_24 = arith.constant dense<0.000000e+00> : vector<2x16x16xf32>
    %77 = tpu.matmul %76, %59, %cst_24 {dimension_numbers = #tpu.dot_dimension_numbers<[2], [1], [1], [2], [0, 0, 0, 1, 1, 2], [0], [0]>} : vector<2x16x16xbf16>, vector<2x16x16xbf16>, vector<2x16x16xf32> -> vector<2x16x16xf32>
    "tpu.trace_stop"() : () -> ()
    %78 = vector.extract_strided_slice %77 {offsets = [0, 0, 0], sizes = [1, 16, 16], strides = [1, 1, 1]} : vector<2x16x16xf32> to vector<1x16x16xf32>
    %79 = vector.shape_cast %78 : vector<1x16x16xf32> to vector<16x16xf32>
    %80 = vector.extract_strided_slice %77 {offsets = [1, 0, 0], sizes = [1, 16, 16], strides = [1, 1, 1]} : vector<2x16x16xf32> to vector<1x16x16xf32>
    %81 = vector.shape_cast %80 : vector<1x16x16xf32> to vector<16x16xf32>
    %82 = tpu.concatenate %79, %81 in 1 : vector<16x16xf32>, vector<16x16xf32> -> vector<16x32xf32>
    %83 = arith.truncf %82 : vector<16x32xf32> to vector<16x32xbf16>
    %c0_25 = arith.constant 0 : index
    %c0_26 = arith.constant 0 : index
    %c96 = arith.constant 96 : index
    %84 = vector.load %arg3[%c0_25, %c0_26, %c96] : memref<2x32x192xbf16, #tpu.memory_space<vmem>>, vector<1x32x32xbf16>
    %85 = vector.shape_cast %84 : vector<1x32x32xbf16> to vector<32x32xbf16>
    %cst_27 = arith.constant dense<0.000000e+00> : vector<16x32xf32>
    %86 = tpu.matmul %83, %85, %cst_27 {dimension_numbers = #tpu.dot_dimension_numbers<[1], [0], [0], [1], [0, 0, 1, 1], [], []>} : vector<16x32xbf16>, vector<32x32xbf16>, vector<16x32xf32> -> vector<16x32xf32>
    %c0_28 = arith.constant 0 : index
    %c96_29 = arith.constant 96 : index
    %87 = vector.load %arg6[%c0_28, %c96_29] : memref<2x352xf32, #tpu.memory_space<vmem>>, vector<1x32xf32>
    %88 = vector.broadcast %87 : vector<1x32xf32> to vector<16x32xf32>
    %89 = arith.addf %86, %88 : vector<16x32xf32>
    %90 = arith.addf %89, %31 : vector<16x32xf32>
    %c0_30 = arith.constant 0 : index
    %c128 = arith.constant 128 : index
    %91 = vector.load %arg6[%c0_30, %c128] : memref<2x352xf32, #tpu.memory_space<vmem>>, vector<1x32xf32>
    %c0_31 = arith.constant 0 : index
    %c160 = arith.constant 160 : index
    %92 = vector.load %arg6[%c0_31, %c160] : memref<2x352xf32, #tpu.memory_space<vmem>>, vector<1x32xf32>
    %cst_32 = arith.constant dense<0.000000e+00> : vector<16xf32>
    %93 = vector.multi_reduction <add>, %90, %cst_32 [1] : vector<16x32xf32> to vector<16xf32>
    %94 = vector.shape_cast %93 : vector<16xf32> to vector<16x1xf32>
    %cst_33 = arith.constant 3.200000e+01 : f32
    %95 = vector.broadcast %cst_33 : f32 to vector<16x1xf32>
    %96 = arith.divf %94, %95 : vector<16x1xf32>
    %97 = vector.broadcast %96 : vector<16x1xf32> to vector<16x32xf32>
    %98 = arith.subf %90, %97 : vector<16x32xf32>
    %99 = arith.mulf %98, %98 : vector<16x32xf32>
    %cst_34 = arith.constant dense<0.000000e+00> : vector<16xf32>
    %100 = vector.multi_reduction <add>, %99, %cst_34 [1] : vector<16x32xf32> to vector<16xf32>
    %101 = vector.shape_cast %100 : vector<16xf32> to vector<16x1xf32>
    %cst_35 = arith.constant 3.200000e+01 : f32
    %102 = vector.broadcast %cst_35 : f32 to vector<16x1xf32>
    %103 = arith.divf %101, %102 : vector<16x1xf32>
    %104 = vector.broadcast %96 : vector<16x1xf32> to vector<16x32xf32>
    %105 = arith.subf %90, %104 : vector<16x32xf32>
    %cst_36 = arith.constant 9.99999996E-13 : f32
    %106 = vector.broadcast %cst_36 : f32 to vector<16x1xf32>
    %107 = arith.addf %103, %106 : vector<16x1xf32>
    %108 = math.rsqrt %107 : vector<16x1xf32>
    %109 = vector.broadcast %108 : vector<16x1xf32> to vector<16x32xf32>
    %110 = arith.mulf %105, %109 : vector<16x32xf32>
    %111 = vector.broadcast %91 : vector<1x32xf32> to vector<16x32xf32>
    %112 = arith.mulf %110, %111 : vector<16x32xf32>
    %113 = vector.broadcast %92 : vector<1x32xf32> to vector<16x32xf32>
    %114 = arith.addf %112, %113 : vector<16x32xf32>
    %115 = arith.truncf %114 : vector<16x32xf32> to vector<16x32xbf16>
    %c0_37 = arith.constant 0 : index
    %c0_38 = arith.constant 0 : index
    %c128_39 = arith.constant 128 : index
    %116 = vector.load %arg3[%c0_37, %c0_38, %c128_39] : memref<2x32x192xbf16, #tpu.memory_space<vmem>>, vector<1x32x64xbf16>
    %117 = vector.shape_cast %116 : vector<1x32x64xbf16> to vector<32x64xbf16>
    %cst_40 = arith.constant dense<0.000000e+00> : vector<16x64xf32>
    %118 = tpu.matmul %115, %117, %cst_40 {dimension_numbers = #tpu.dot_dimension_numbers<[1], [0], [0], [1], [0, 0, 1, 1], [], []>} : vector<16x32xbf16>, vector<32x64xbf16>, vector<16x64xf32> -> vector<16x64xf32>
    %c0_41 = arith.constant 0 : index
    %c192 = arith.constant 192 : index
    %119 = vector.load %arg6[%c0_41, %c192] : memref<2x352xf32, #tpu.memory_space<vmem>>, vector<1x64xf32>
    %120 = vector.broadcast %119 : vector<1x64xf32> to vector<16x64xf32>
    %121 = arith.addf %118, %120 : vector<16x64xf32>
    %cst_42 = arith.constant 5.000000e-01 : f32
    %122 = vector.broadcast %cst_42 : f32 to vector<16x64xf32>
    %123 = arith.mulf %122, %121 : vector<16x64xf32>
    %cst_43 = arith.constant 4.471500e-02 : f32
    %124 = vector.broadcast %cst_43 : f32 to vector<16x64xf32>
    %125 = arith.mulf %124, %121 : vector<16x64xf32>
    %126 = arith.mulf %125, %121 : vector<16x64xf32>
    %127 = arith.mulf %126, %121 : vector<16x64xf32>
    %128 = arith.addf %121, %127 : vector<16x64xf32>
    %cst_44 = arith.constant 0.797884583 : f32
    %129 = vector.broadcast %cst_44 : f32 to vector<16x64xf32>
    %130 = arith.mulf %129, %128 : vector<16x64xf32>
    %131 = math.tanh %130 : vector<16x64xf32>
    %cst_45 = arith.constant 1.000000e+00 : f32
    %132 = vector.broadcast %cst_45 : f32 to vector<16x64xf32>
    %133 = arith.addf %132, %131 : vector<16x64xf32>
    %134 = arith.mulf %123, %133 : vector<16x64xf32>
    %135 = arith.truncf %134 : vector<16x64xf32> to vector<16x64xbf16>
    %c0_46 = arith.constant 0 : index
    %c0_47 = arith.constant 0 : index
    %c0_48 = arith.constant 0 : index
    %136 = vector.load %arg4[%c0_46, %c0_47, %c0_48] : memref<2x64x32xbf16, #tpu.memory_space<vmem>>, vector<1x64x32xbf16>
    %137 = vector.shape_cast %136 : vector<1x64x32xbf16> to vector<64x32xbf16>
    %cst_49 = arith.constant dense<0.000000e+00> : vector<16x32xf32>
    %138 = tpu.matmul %135, %137, %cst_49 {dimension_numbers = #tpu.dot_dimension_numbers<[1], [0], [0], [1], [0, 0, 1, 1], [], []>} : vector<16x64xbf16>, vector<64x32xbf16>, vector<16x32xf32> -> vector<16x32xf32>
    %c0_50 = arith.constant 0 : index
    %c256 = arith.constant 256 : index
    %139 = vector.load %arg6[%c0_50, %c256] : memref<2x352xf32, #tpu.memory_space<vmem>>, vector<1x32xf32>
    %140 = vector.broadcast %139 : vector<1x32xf32> to vector<16x32xf32>
    %141 = arith.addf %138, %140 : vector<16x32xf32>
    %142 = arith.addf %141, %114 : vector<16x32xf32>
    %c0_51 = arith.constant 0 : index
    %c288 = arith.constant 288 : index
    %143 = vector.load %arg6[%c0_51, %c288] : memref<2x352xf32, #tpu.memory_space<vmem>>, vector<1x32xf32>
    %c0_52 = arith.constant 0 : index
    %c320 = arith.constant 320 : index
    %144 = vector.load %arg6[%c0_52, %c320] : memref<2x352xf32, #tpu.memory_space<vmem>>, vector<1x32xf32>
    %cst_53 = arith.constant dense<0.000000e+00> : vector<16xf32>
    %145 = vector.multi_reduction <add>, %142, %cst_53 [1] : vector<16x32xf32> to vector<16xf32>
    %146 = vector.shape_cast %145 : vector<16xf32> to vector<16x1xf32>
    %cst_54 = arith.constant 3.200000e+01 : f32
    %147 = vector.broadcast %cst_54 : f32 to vector<16x1xf32>
    %148 = arith.divf %146, %147 : vector<16x1xf32>
    %149 = vector.broadcast %148 : vector<16x1xf32> to vector<16x32xf32>
    %150 = arith.subf %142, %149 : vector<16x32xf32>
    %151 = arith.mulf %150, %150 : vector<16x32xf32>
    %cst_55 = arith.constant dense<0.000000e+00> : vector<16xf32>
    %152 = vector.multi_reduction <add>, %151, %cst_55 [1] : vector<16x32xf32> to vector<16xf32>
    %153 = vector.shape_cast %152 : vector<16xf32> to vector<16x1xf32>
    %cst_56 = arith.constant 3.200000e+01 : f32
    %154 = vector.broadcast %cst_56 : f32 to vector<16x1xf32>
    %155 = arith.divf %153, %154 : vector<16x1xf32>
    %156 = vector.broadcast %148 : vector<16x1xf32> to vector<16x32xf32>
    %157 = arith.subf %142, %156 : vector<16x32xf32>
    %cst_57 = arith.constant 9.99999996E-13 : f32
    %158 = vector.broadcast %cst_57 : f32 to vector<16x1xf32>
    %159 = arith.addf %155, %158 : vector<16x1xf32>
    %160 = math.rsqrt %159 : vector<16x1xf32>
    %161 = vector.broadcast %160 : vector<16x1xf32> to vector<16x32xf32>
    %162 = arith.mulf %157, %161 : vector<16x32xf32>
    %163 = vector.broadcast %143 : vector<1x32xf32> to vector<16x32xf32>
    %164 = arith.mulf %162, %163 : vector<16x32xf32>
    %165 = vector.broadcast %144 : vector<1x32xf32> to vector<16x32xf32>
    %166 = arith.addf %164, %165 : vector<16x32xf32>
    %167 = arith.truncf %166 : vector<16x32xf32> to vector<16x32xbf16>
    %c1 = arith.constant 1 : index
    %c0_58 = arith.constant 0 : index
    %c0_59 = arith.constant 0 : index
    %168 = vector.load %arg3[%c1, %c0_58, %c0_59] : memref<2x32x192xbf16, #tpu.memory_space<vmem>>, vector<1x32x96xbf16>
    %169 = vector.shape_cast %168 : vector<1x32x96xbf16> to vector<32x96xbf16>
    %cst_60 = arith.constant dense<0.000000e+00> : vector<16x96xf32>
    %170 = tpu.matmul %167, %169, %cst_60 {dimension_numbers = #tpu.dot_dimension_numbers<[1], [0], [0], [1], [0, 0, 1, 1], [], []>} : vector<16x32xbf16>, vector<32x96xbf16>, vector<16x96xf32> -> vector<16x96xf32>
    %c1_61 = arith.constant 1 : index
    %c0_62 = arith.constant 0 : index
    %171 = vector.load %arg6[%c1_61, %c0_62] : memref<2x352xf32, #tpu.memory_space<vmem>>, vector<1x96xf32>
    %172 = vector.broadcast %171 : vector<1x96xf32> to vector<16x96xf32>
    %173 = arith.addf %170, %172 : vector<16x96xf32>
    %174 = vector.extract_strided_slice %173 {offsets = [0, 0], sizes = [16, 32], strides = [1, 1]} : vector<16x96xf32> to vector<16x32xf32>
    %175 = vector.extract_strided_slice %174 {offsets = [0, 0], sizes = [16, 16], strides = [1, 1]} : vector<16x32xf32> to vector<16x16xf32>
    %176 = vector.extract_strided_slice %174 {offsets = [0, 16], sizes = [16, 16], strides = [1, 1]} : vector<16x32xf32> to vector<16x16xf32>
    %177 = vector.shape_cast %175 : vector<16x16xf32> to vector<1x16x16xf32>
    %178 = vector.shape_cast %176 : vector<16x16xf32> to vector<1x16x16xf32>
    %179 = tpu.concatenate %177, %178 in 0 : vector<1x16x16xf32>, vector<1x16x16xf32> -> vector<2x16x16xf32>
    %180 = arith.truncf %179 : vector<2x16x16xf32> to vector<2x16x16xbf16>
    %181 = vector.extract_strided_slice %173 {offsets = [0, 32], sizes = [16, 32], strides = [1, 1]} : vector<16x96xf32> to vector<16x32xf32>
    %182 = vector.extract_strided_slice %181 {offsets = [0, 0], sizes = [16, 16], strides = [1, 1]} : vector<16x32xf32> to vector<16x16xf32>
    %183 = vector.extract_strided_slice %181 {offsets = [0, 16], sizes = [16, 16], strides = [1, 1]} : vector<16x32xf32> to vector<16x16xf32>
    %184 = vector.shape_cast %182 : vector<16x16xf32> to vector<1x16x16xf32>
    %185 = vector.shape_cast %183 : vector<16x16xf32> to vector<1x16x16xf32>
    %186 = tpu.concatenate %184, %185 in 0 : vector<1x16x16xf32>, vector<1x16x16xf32> -> vector<2x16x16xf32>
    %187 = arith.truncf %186 : vector<2x16x16xf32> to vector<2x16x16xbf16>
    %188 = vector.extract_strided_slice %173 {offsets = [0, 64], sizes = [16, 32], strides = [1, 1]} : vector<16x96xf32> to vector<16x32xf32>
    %189 = vector.extract_strided_slice %188 {offsets = [0, 0], sizes = [16, 16], strides = [1, 1]} : vector<16x32xf32> to vector<16x16xf32>
    %190 = vector.extract_strided_slice %188 {offsets = [0, 16], sizes = [16, 16], strides = [1, 1]} : vector<16x32xf32> to vector<16x16xf32>
    %191 = vector.shape_cast %189 : vector<16x16xf32> to vector<1x16x16xf32>
    %192 = vector.shape_cast %190 : vector<16x16xf32> to vector<1x16x16xf32>
    %193 = tpu.concatenate %191, %192 in 0 : vector<1x16x16xf32>, vector<1x16x16xf32> -> vector<2x16x16xf32>
    %194 = arith.truncf %193 : vector<2x16x16xf32> to vector<2x16x16xbf16>
    "tpu.trace_start"() <{level = 10 : i32, message = "hqd,hkd->hqk"}> : () -> ()
    %cst_63 = arith.constant dense<0.000000e+00> : vector<2x16x16xf32>
    %195 = tpu.matmul %180, %187, %cst_63 {dimension_numbers = #tpu.dot_dimension_numbers<[2], [2], [1], [1], [0, 0, 0, 1, 1, 1], [0], [0]>} : vector<2x16x16xbf16>, vector<2x16x16xbf16>, vector<2x16x16xf32> -> vector<2x16x16xf32>
    "tpu.trace_stop"() : () -> ()
    %cst_64 = arith.constant 2.500000e-01 : f32
    %196 = vector.broadcast %cst_64 : f32 to vector<2x16x16xf32>
    %197 = arith.mulf %195, %196 : vector<2x16x16xf32>
    %198 = vector.shape_cast %5 : vector<1x16xf32> to vector<1x1x16xf32>
    %199 = vector.broadcast %198 : vector<1x1x16xf32> to vector<2x16x16xf32>
    %200 = arith.addf %197, %199 : vector<2x16x16xf32>
    %cst_65 = arith.constant dense<0xFF800000> : vector<2x16xf32>
    %201 = vector.multi_reduction <maximumf>, %200, %cst_65 [2] : vector<2x16x16xf32> to vector<2x16xf32>
    %202 = vector.shape_cast %201 : vector<2x16xf32> to vector<2x16x1xf32>
    %203 = vector.broadcast %202 : vector<2x16x1xf32> to vector<2x16x16xf32>
    %204 = arith.subf %200, %203 : vector<2x16x16xf32>
    %205 = math.exp %204 : vector<2x16x16xf32>
    %cst_66 = arith.constant dense<0.000000e+00> : vector<2x16xf32>
    %206 = vector.multi_reduction <add>, %205, %cst_66 [2] : vector<2x16x16xf32> to vector<2x16xf32>
    %207 = vector.shape_cast %206 : vector<2x16xf32> to vector<2x16x1xf32>
    %208 = tpu.reciprocal %207 {approx = true} : vector<2x16x1xf32> -> vector<2x16x1xf32>
    %209 = vector.broadcast %208 : vector<2x16x1xf32> to vector<2x16x16xf32>
    %210 = arith.mulf %205, %209 : vector<2x16x16xf32>
    %211 = arith.truncf %210 : vector<2x16x16xf32> to vector<2x16x16xbf16>
    "tpu.trace_start"() <{level = 10 : i32, message = "hqk,hkd->hqd"}> : () -> ()
    %cst_67 = arith.constant dense<0.000000e+00> : vector<2x16x16xf32>
    %212 = tpu.matmul %211, %194, %cst_67 {dimension_numbers = #tpu.dot_dimension_numbers<[2], [1], [1], [2], [0, 0, 0, 1, 1, 2], [0], [0]>} : vector<2x16x16xbf16>, vector<2x16x16xbf16>, vector<2x16x16xf32> -> vector<2x16x16xf32>
    "tpu.trace_stop"() : () -> ()
    %213 = vector.extract_strided_slice %212 {offsets = [0, 0, 0], sizes = [1, 16, 16], strides = [1, 1, 1]} : vector<2x16x16xf32> to vector<1x16x16xf32>
    %214 = vector.shape_cast %213 : vector<1x16x16xf32> to vector<16x16xf32>
    %215 = vector.extract_strided_slice %212 {offsets = [1, 0, 0], sizes = [1, 16, 16], strides = [1, 1, 1]} : vector<2x16x16xf32> to vector<1x16x16xf32>
    %216 = vector.shape_cast %215 : vector<1x16x16xf32> to vector<16x16xf32>
    %217 = tpu.concatenate %214, %216 in 1 : vector<16x16xf32>, vector<16x16xf32> -> vector<16x32xf32>
    %218 = arith.truncf %217 : vector<16x32xf32> to vector<16x32xbf16>
    %c1_68 = arith.constant 1 : index
    %c0_69 = arith.constant 0 : index
    %c96_70 = arith.constant 96 : index
    %219 = vector.load %arg3[%c1_68, %c0_69, %c96_70] : memref<2x32x192xbf16, #tpu.memory_space<vmem>>, vector<1x32x32xbf16>
    %220 = vector.shape_cast %219 : vector<1x32x32xbf16> to vector<32x32xbf16>
    %cst_71 = arith.constant dense<0.000000e+00> : vector<16x32xf32>
    %221 = tpu.matmul %218, %220, %cst_71 {dimension_numbers = #tpu.dot_dimension_numbers<[1], [0], [0], [1], [0, 0, 1, 1], [], []>} : vector<16x32xbf16>, vector<32x32xbf16>, vector<16x32xf32> -> vector<16x32xf32>
    %c1_72 = arith.constant 1 : index
    %c96_73 = arith.constant 96 : index
    %222 = vector.load %arg6[%c1_72, %c96_73] : memref<2x352xf32, #tpu.memory_space<vmem>>, vector<1x32xf32>
    %223 = vector.broadcast %222 : vector<1x32xf32> to vector<16x32xf32>
    %224 = arith.addf %221, %223 : vector<16x32xf32>
    %225 = arith.addf %224, %166 : vector<16x32xf32>
    %c1_74 = arith.constant 1 : index
    %c128_75 = arith.constant 128 : index
    %226 = vector.load %arg6[%c1_74, %c128_75] : memref<2x352xf32, #tpu.memory_space<vmem>>, vector<1x32xf32>
    %c1_76 = arith.constant 1 : index
    %c160_77 = arith.constant 160 : index
    %227 = vector.load %arg6[%c1_76, %c160_77] : memref<2x352xf32, #tpu.memory_space<vmem>>, vector<1x32xf32>
    %cst_78 = arith.constant dense<0.000000e+00> : vector<16xf32>
    %228 = vector.multi_reduction <add>, %225, %cst_78 [1] : vector<16x32xf32> to vector<16xf32>
    %229 = vector.shape_cast %228 : vector<16xf32> to vector<16x1xf32>
    %cst_79 = arith.constant 3.200000e+01 : f32
    %230 = vector.broadcast %cst_79 : f32 to vector<16x1xf32>
    %231 = arith.divf %229, %230 : vector<16x1xf32>
    %232 = vector.broadcast %231 : vector<16x1xf32> to vector<16x32xf32>
    %233 = arith.subf %225, %232 : vector<16x32xf32>
    %234 = arith.mulf %233, %233 : vector<16x32xf32>
    %cst_80 = arith.constant dense<0.000000e+00> : vector<16xf32>
    %235 = vector.multi_reduction <add>, %234, %cst_80 [1] : vector<16x32xf32> to vector<16xf32>
    %236 = vector.shape_cast %235 : vector<16xf32> to vector<16x1xf32>
    %cst_81 = arith.constant 3.200000e+01 : f32
    %237 = vector.broadcast %cst_81 : f32 to vector<16x1xf32>
    %238 = arith.divf %236, %237 : vector<16x1xf32>
    %239 = vector.broadcast %231 : vector<16x1xf32> to vector<16x32xf32>
    %240 = arith.subf %225, %239 : vector<16x32xf32>
    %cst_82 = arith.constant 9.99999996E-13 : f32
    %241 = vector.broadcast %cst_82 : f32 to vector<16x1xf32>
    %242 = arith.addf %238, %241 : vector<16x1xf32>
    %243 = math.rsqrt %242 : vector<16x1xf32>
    %244 = vector.broadcast %243 : vector<16x1xf32> to vector<16x32xf32>
    %245 = arith.mulf %240, %244 : vector<16x32xf32>
    %246 = vector.broadcast %226 : vector<1x32xf32> to vector<16x32xf32>
    %247 = arith.mulf %245, %246 : vector<16x32xf32>
    %248 = vector.broadcast %227 : vector<1x32xf32> to vector<16x32xf32>
    %249 = arith.addf %247, %248 : vector<16x32xf32>
    %250 = arith.truncf %249 : vector<16x32xf32> to vector<16x32xbf16>
    %c1_83 = arith.constant 1 : index
    %c0_84 = arith.constant 0 : index
    %c128_85 = arith.constant 128 : index
    %251 = vector.load %arg3[%c1_83, %c0_84, %c128_85] : memref<2x32x192xbf16, #tpu.memory_space<vmem>>, vector<1x32x64xbf16>
    %252 = vector.shape_cast %251 : vector<1x32x64xbf16> to vector<32x64xbf16>
    %cst_86 = arith.constant dense<0.000000e+00> : vector<16x64xf32>
    %253 = tpu.matmul %250, %252, %cst_86 {dimension_numbers = #tpu.dot_dimension_numbers<[1], [0], [0], [1], [0, 0, 1, 1], [], []>} : vector<16x32xbf16>, vector<32x64xbf16>, vector<16x64xf32> -> vector<16x64xf32>
    %c1_87 = arith.constant 1 : index
    %c192_88 = arith.constant 192 : index
    %254 = vector.load %arg6[%c1_87, %c192_88] : memref<2x352xf32, #tpu.memory_space<vmem>>, vector<1x64xf32>
    %255 = vector.broadcast %254 : vector<1x64xf32> to vector<16x64xf32>
    %256 = arith.addf %253, %255 : vector<16x64xf32>
    %cst_89 = arith.constant 5.000000e-01 : f32
    %257 = vector.broadcast %cst_89 : f32 to vector<16x64xf32>
    %258 = arith.mulf %257, %256 : vector<16x64xf32>
    %cst_90 = arith.constant 4.471500e-02 : f32
    %259 = vector.broadcast %cst_90 : f32 to vector<16x64xf32>
    %260 = arith.mulf %259, %256 : vector<16x64xf32>
    %261 = arith.mulf %260, %256 : vector<16x64xf32>
    %262 = arith.mulf %261, %256 : vector<16x64xf32>
    %263 = arith.addf %256, %262 : vector<16x64xf32>
    %cst_91 = arith.constant 0.797884583 : f32
    %264 = vector.broadcast %cst_91 : f32 to vector<16x64xf32>
    %265 = arith.mulf %264, %263 : vector<16x64xf32>
    %266 = math.tanh %265 : vector<16x64xf32>
    %cst_92 = arith.constant 1.000000e+00 : f32
    %267 = vector.broadcast %cst_92 : f32 to vector<16x64xf32>
    %268 = arith.addf %267, %266 : vector<16x64xf32>
    %269 = arith.mulf %258, %268 : vector<16x64xf32>
    %270 = arith.truncf %269 : vector<16x64xf32> to vector<16x64xbf16>
    %c1_93 = arith.constant 1 : index
    %c0_94 = arith.constant 0 : index
    %c0_95 = arith.constant 0 : index
    %271 = vector.load %arg4[%c1_93, %c0_94, %c0_95] : memref<2x64x32xbf16, #tpu.memory_space<vmem>>, vector<1x64x32xbf16>
    %272 = vector.shape_cast %271 : vector<1x64x32xbf16> to vector<64x32xbf16>
    %cst_96 = arith.constant dense<0.000000e+00> : vector<16x32xf32>
    %273 = tpu.matmul %270, %272, %cst_96 {dimension_numbers = #tpu.dot_dimension_numbers<[1], [0], [0], [1], [0, 0, 1, 1], [], []>} : vector<16x64xbf16>, vector<64x32xbf16>, vector<16x32xf32> -> vector<16x32xf32>
    %c1_97 = arith.constant 1 : index
    %c256_98 = arith.constant 256 : index
    %274 = vector.load %arg6[%c1_97, %c256_98] : memref<2x352xf32, #tpu.memory_space<vmem>>, vector<1x32xf32>
    %275 = vector.broadcast %274 : vector<1x32xf32> to vector<16x32xf32>
    %276 = arith.addf %273, %275 : vector<16x32xf32>
    %277 = arith.addf %276, %249 : vector<16x32xf32>
    %c1_99 = arith.constant 1 : index
    %c288_100 = arith.constant 288 : index
    %278 = vector.load %arg6[%c1_99, %c288_100] : memref<2x352xf32, #tpu.memory_space<vmem>>, vector<1x32xf32>
    %c1_101 = arith.constant 1 : index
    %c320_102 = arith.constant 320 : index
    %279 = vector.load %arg6[%c1_101, %c320_102] : memref<2x352xf32, #tpu.memory_space<vmem>>, vector<1x32xf32>
    %cst_103 = arith.constant dense<0.000000e+00> : vector<16xf32>
    %280 = vector.multi_reduction <add>, %277, %cst_103 [1] : vector<16x32xf32> to vector<16xf32>
    %281 = vector.shape_cast %280 : vector<16xf32> to vector<16x1xf32>
    %cst_104 = arith.constant 3.200000e+01 : f32
    %282 = vector.broadcast %cst_104 : f32 to vector<16x1xf32>
    %283 = arith.divf %281, %282 : vector<16x1xf32>
    %284 = vector.broadcast %283 : vector<16x1xf32> to vector<16x32xf32>
    %285 = arith.subf %277, %284 : vector<16x32xf32>
    %286 = arith.mulf %285, %285 : vector<16x32xf32>
    %cst_105 = arith.constant dense<0.000000e+00> : vector<16xf32>
    %287 = vector.multi_reduction <add>, %286, %cst_105 [1] : vector<16x32xf32> to vector<16xf32>
    %288 = vector.shape_cast %287 : vector<16xf32> to vector<16x1xf32>
    %cst_106 = arith.constant 3.200000e+01 : f32
    %289 = vector.broadcast %cst_106 : f32 to vector<16x1xf32>
    %290 = arith.divf %288, %289 : vector<16x1xf32>
    %291 = vector.broadcast %283 : vector<16x1xf32> to vector<16x32xf32>
    %292 = arith.subf %277, %291 : vector<16x32xf32>
    %cst_107 = arith.constant 9.99999996E-13 : f32
    %293 = vector.broadcast %cst_107 : f32 to vector<16x1xf32>
    %294 = arith.addf %290, %293 : vector<16x1xf32>
    %295 = math.rsqrt %294 : vector<16x1xf32>
    %296 = vector.broadcast %295 : vector<16x1xf32> to vector<16x32xf32>
    %297 = arith.mulf %292, %296 : vector<16x32xf32>
    %298 = vector.broadcast %278 : vector<1x32xf32> to vector<16x32xf32>
    %299 = arith.mulf %297, %298 : vector<16x32xf32>
    %300 = vector.broadcast %279 : vector<1x32xf32> to vector<16x32xf32>
    %301 = arith.addf %299, %300 : vector<16x32xf32>
    %cst_108 = arith.constant dense<0.000000e+00> : vector<1x32xf32>
    %302 = tpu.matmul %1, %301, %cst_108 {dimension_numbers = #tpu.dot_dimension_numbers<[1], [0], [0], [1], [0, 0, 1, 1], [], []>} : vector<1x16xf32>, vector<16x32xf32>, vector<1x32xf32> -> vector<1x32xf32>
    %cst_109 = arith.constant dense<0.000000e+00> : vector<1xf32>
    %303 = vector.multi_reduction <add>, %1, %cst_109 [1] : vector<1x16xf32> to vector<1xf32>
    %304 = vector.shape_cast %303 : vector<1xf32> to vector<1x1xf32>
    %cst_110 = arith.constant 1.000000e+00 : f32
    %305 = vector.broadcast %cst_110 : f32 to vector<1x1xf32>
    %306 = arith.maximumf %304, %305 : vector<1x1xf32>
    %307 = vector.broadcast %306 : vector<1x1xf32> to vector<1x32xf32>
    %308 = arith.divf %302, %307 : vector<1x32xf32>
    %309 = arith.truncf %308 : vector<1x32xf32> to vector<1x32xbf16>
    %c0_111 = arith.constant 0 : index
    %c0_112 = arith.constant 0 : index
    %310 = vector.load %arg5[%c0_111, %c0_112] : memref<32x37xbf16, #tpu.memory_space<vmem>>, vector<32x32xbf16>
    %cst_113 = arith.constant dense<0.000000e+00> : vector<1x32xf32>
    %311 = tpu.matmul %309, %310, %cst_113 {dimension_numbers = #tpu.dot_dimension_numbers<[1], [0], [0], [1], [0, 0, 1, 1], [], []>} : vector<1x32xbf16>, vector<32x32xbf16>, vector<1x32xf32> -> vector<1x32xf32>
    %c0_114 = arith.constant 0 : index
    %c64 = arith.constant 64 : index
    %312 = vector.load %arg7[%c0_114, %c64] : memref<1x101xf32, #tpu.memory_space<vmem>>, vector<1x32xf32>
    %313 = arith.addf %311, %312 : vector<1x32xf32>
    %cst_115 = arith.constant 0.000000e+00 : f32
    %314 = vector.broadcast %cst_115 : f32 to vector<1x32xf32>
    %315 = arith.maximumf %313, %314 : vector<1x32xf32>
    %316 = arith.truncf %315 : vector<1x32xf32> to vector<1x32xbf16>
    %c0_116 = arith.constant 0 : index
    %c32_117 = arith.constant 32 : index
    %317 = vector.load %arg5[%c0_116, %c32_117] : memref<32x37xbf16, #tpu.memory_space<vmem>>, vector<32x5xbf16>
    %cst_118 = arith.constant dense<0.000000e+00> : vector<1x5xf32>
    %318 = tpu.matmul %316, %317, %cst_118 {dimension_numbers = #tpu.dot_dimension_numbers<[1], [0], [0], [1], [0, 0, 1, 1], [], []>} : vector<1x32xbf16>, vector<32x5xbf16>, vector<1x5xf32> -> vector<1x5xf32>
    %c0_119 = arith.constant 0 : index
    %c96_120 = arith.constant 96 : index
    %319 = vector.load %arg7[%c0_119, %c96_120] : memref<1x101xf32, #tpu.memory_space<vmem>>, vector<1x5xf32>
    %320 = arith.addf %318, %319 : vector<1x5xf32>
    %321 = arith.negf %320 : vector<1x5xf32>
    %322 = math.exp %321 : vector<1x5xf32>
    %cst_121 = arith.constant 1.000000e+00 : f32
    %323 = vector.broadcast %cst_121 : f32 to vector<1x5xf32>
    %324 = arith.addf %323, %322 : vector<1x5xf32>
    %325 = arith.divf %323, %324 : vector<1x5xf32>
    %cst_122 = arith.constant 0.000000e+00 : f32
    %326 = vector.broadcast %cst_122 : f32 to vector<8x128xf32>
    %c0_123 = arith.constant 0 : index
    %c0_124 = arith.constant 0 : index
    %c0_125 = arith.constant 0 : index
    %327 = vector.load %arg8[%c0_123, %c0_124, %c0_125] : memref<1x8x128xf32, #tpu.memory_space<vmem>>, vector<1x8x128xf32>
    %328 = vector.shape_cast %327 : vector<1x8x128xf32> to vector<8x128xf32>
    %329 = vector.shape_cast %326 : vector<8x128xf32> to vector<1x8x128xf32>
    tpu.vector_store %arg8[%c0_123, %c0_124, %c0_125], %329 {strides = array<i32>} : memref<1x8x128xf32, #tpu.memory_space<vmem>>, vector<1x8x128xf32>,
    %c0_126 = arith.constant 0 : index
    %c0_127 = arith.constant 0 : index
    %c0_128 = arith.constant 0 : index
    %330 = vector.load %arg8[%c0_126, %c0_127, %c0_128] : memref<1x8x128xf32, #tpu.memory_space<vmem>>, vector<1x1x5xf32>
    %331 = vector.shape_cast %330 : vector<1x1x5xf32> to vector<1x5xf32>
    %332 = vector.shape_cast %325 : vector<1x5xf32> to vector<1x1x5xf32>
    tpu.vector_store %arg8[%c0_126, %c0_127, %c0_128], %332 {strides = array<i32>} : memref<1x8x128xf32, #tpu.memory_space<vmem>>, vector<1x1x5xf32>,
    return
  }
  func.func @transform_0(%arg0: i32) -> (i32, i32, i32) {
    %c0_i32 = arith.constant 0 : i32
    %c0_i32_0 = arith.constant 0 : i32
    %c0_i32_1 = arith.constant 0 : i32
    return %arg0, %c0_i32, %c0_i32_0 : i32, i32, i32
  }
  func.func @transform_1(%arg0: i32) -> (i32, i32, i32) {
    %c0_i32 = arith.constant 0 : i32
    %c0_i32_0 = arith.constant 0 : i32
    %c0_i32_1 = arith.constant 0 : i32
    return %arg0, %c0_i32, %c0_i32_0 : i32, i32, i32
  }
  func.func @transform_2(%arg0: i32) -> (i32, i32, i32) {
    %c0_i32 = arith.constant 0 : i32
    %c0_i32_0 = arith.constant 0 : i32
    %c0_i32_1 = arith.constant 0 : i32
    %c0_i32_2 = arith.constant 0 : i32
    return %c0_i32, %c0_i32_0, %c0_i32_1 : i32, i32, i32
  }
  func.func @transform_3(%arg0: i32) -> (i32, i32, i32) {
    %c0_i32 = arith.constant 0 : i32
    %c0_i32_0 = arith.constant 0 : i32
    %c0_i32_1 = arith.constant 0 : i32
    %c0_i32_2 = arith.constant 0 : i32
    return %c0_i32, %c0_i32_0, %c0_i32_1 : i32, i32, i32
  }
  func.func @transform_4(%arg0: i32) -> (i32, i32) {
    %c0_i32 = arith.constant 0 : i32
    %c0_i32_0 = arith.constant 0 : i32
    %c0_i32_1 = arith.constant 0 : i32
    return %c0_i32, %c0_i32_0 : i32, i32
  }
  func.func @transform_5(%arg0: i32) -> (i32, i32) {
    %c0_i32 = arith.constant 0 : i32
    %c0_i32_0 = arith.constant 0 : i32
    %c0_i32_1 = arith.constant 0 : i32
    return %c0_i32, %c0_i32_0 : i32, i32
  }
  func.func @transform_6(%arg0: i32) -> (i32, i32) {
    %c0_i32 = arith.constant 0 : i32
    %c0_i32_0 = arith.constant 0 : i32
    %c0_i32_1 = arith.constant 0 : i32
    return %c0_i32, %c0_i32_0 : i32, i32
  }
  func.func @transform_7(%arg0: i32) -> (i32, i32, i32) {
    %c0_i32 = arith.constant 0 : i32
    %c0_i32_0 = arith.constant 0 : i32
    %c0_i32_1 = arith.constant 0 : i32
    return %arg0, %c0_i32, %c0_i32_0 : i32, i32, i32
  }
}

</mosaic_0001>

<bundles_post_ra>
// kernel: model_forward.1
= control target key start
LH: loop header
LB: loop body
LE: loop exit
PB: predicated region body
PF: predicated region fallthrough
CT: control target
= control target key end

     0   :  { %s2391_s24 = smov 0   ;;  %s2733_s0 = inlined_call_operand.vmem [shape: f32[2,16,32], index: 0, kind: input, shape index: {}]   ;;  %s2734_s1 = inlined_call_operand.vmem [shape: f32[2,1,16], index: 1, kind: input, shape index: {}]   ;;  %s2735_s2 = inlined_call_operand.vmem [shape: bf16[2,32,192], index: 2, kind: input, shape index: {}]   ;;  %s2736_s3 = inlined_call_operand.vmem [shape: bf16[2,64,32], index: 3, kind: input, shape index: {}]   ;;  %s2737_s4 = inlined_call_operand.vmem [shape: bf16[32,37], index: 4, kind: input, shape index: {}]   ;;  %s2738_s5 = inlined_call_operand.vmem [shape: f32[2,352], index: 5, kind: input, shape index: {}]   ;;  %s2739_s6 = inlined_call_operand.vmem [shape: f32[1,101], index: 6, kind: input, shape index: {}]   ;;  %s2740_s7 = inlined_call_operand.vmem [shape: f32[2,8,128], index: 7, kind: output, shape index: {}]  }
   0x1 LB: > { %s1927_s25 = sadd.s32 4294967295, %s2341_s24   ;;  %p1931_p0 = scmp.ge.s32.totalorder %s2341_s24, 1  ;;  %s2341_s24 = sphi %s2391_s24, %s17_s24  }
   0x2   : > { %p245_p1 = scmp.lt.s32.totalorder %s2341_s24, 3 }
   0x4   : > { %p246_p2 = pnand %p1931_p0, %p245_p1 }
   0x5   : > { %p279_p3 = scmp.lt.s32.totalorder (!%p246_p2), %s1927_s25, 1  ;;  %v2343_v0 = vmov (!%p246_p2), 0.0   ;;  %vm298_vm0 = vcmask (!%p246_p2), 261120   ;;  %v1935_v5 = vld [vmem:[%s2739_s6] ss:$0 sm:$0xff] (!%p246_p2)  ;;  %s2344_s13 = smov (!%p246_p2), 96   ;;  %v521_v51 = vlaneseq (!%p246_p2) }
   0x6   : > { %249 = sbr.rel (%p246_p2) target bundleno = 6298 (0x189a), region = 48  ;;  %2063 = vmatprep.subr.bf16.mxu0 (!%p246_p2), %v2343_v0  ;;  %2071 = vmatprep.subr.bf16.mxu1 (!%p246_p2), %v2343_v0  ;;  %v2245_v16 = vld [vmem:[%s2735_s2] ss:$8 sps:$4 sm:$0xff] (!%p246_p2)   ;;  %v2246_v17 = vld [vmem:[%s2735_s2 + $0x10] ss:$8 sps:$4 sm:$0xff] (!%p246_p2)   ;;  %vm2345_vm1 = vmmov (!%p246_p2), 0  }
   0x7   : > { %2064 = vmatpush3.bf16.msra.mxu0 (!%p246_p2), %v2245_v16  ;;  %2067 = vmatprep.mubr.msk.bf16.mxu0 (!%p246_p2), %vm2345_vm1, %v2343_v0  ;;  %v2447_v34 = vld [vmem:[%s2738_s5] ss:$0 sm:$0xff] (!%p246_p2)  ;;  %s2346_s20 = smov (!%p246_p2), 112   ;;  %vm418_vm2 = vcmask (!%p246_p2), 130048   ;;  %v522_v54 = vshrl.u32 (!%p246_p2), %v521_v51, 7  ;;  %s2348_s28 = smov (!%p246_p2), 32  }
   0x8   : > { %2065 = vmatprep.subr.bf16.mxu0 (!%p246_p2), %v2343_v0  ;;  %2073 = vmatprep.mubr.msk.bf16.mxu1 (!%p246_p2), %vm2345_vm1, %v2343_v0  ;;  %s2349_s8 = smov (!%p246_p2), 16   ;;  %vm915_vm3 = vcmask (!%p246_p2), 523264   ;;  %vm1726_vm4 = vcmask (!%p246_p2), 122880   ;;  %vm1863_vm5 = vcmask (!%p246_p2), 32768  }
   0x9   : > { %v523_v56 = vsub.s32 (!%p246_p2), 0, %v522_v54  ;;  %v2247_v54 = vld [vmem:[%s2735_s2] ss:$8 sps:$4 sm:$0xff] (!%p246_p2)  }
   0xb   : > { %2066 = vmatpush3.bf16.msra.mxu0 (!%p246_p2), %v2246_v17 }
   0xc   : > { %2077 = vmatprep.subr.bf16.mxu0 (!%p246_p2), %v2343_v0 }
   0xd   : > { %s2742_s25 = smov (!%p279_p3, %s1927_s25), 1 }
   0xe   : > { %s2009_s26 = sshll.u32 %s2742_s25, 4  ;;  %s1934_s30 = sshll.u32 %s2742_s25, 3 }
   0xf   : > { %s283_s29 = scalar_lea.vmem %s2733_s0, %s2009_s26  ;;  %s2411_s10 = scalar_lea.vmem %s2740_s7, %s1934_s30 }
  0x10   : > { %v295_v1 = vld [vmem:[%s283_s29] sm:$0xff]  ;;  %v296_v2 = vld [vmem:[%s283_s29 + $0x8] sm:$0xff]  ;;  %1862 = vst [vmem:[%s2411_s10] sm:$0xff] %v2343_v0  ;;  %s2476_s23 = scalar_lea.vmem %s2734_s1, %s2742_s25  ;;  %s2347_s25 = smov 64  }
  0x11   : > { %v299_v3 = vsel %vm298_vm0, %v295_v1, 0.0  ;;  %v302_v4 = vsel %vm298_vm0, %v296_v2, 0.0  ;;  %v292_v52 = vld [vmem:[%s2476_s23] sm:$0x1] }
  0x12   : > { %300 = vadd.xlane.f32.xlu0 %v299_v3  ;;  %v293_v53 = vsub.f32 1.0, %v292_v52 }
  0x14   : > { %v294_v55 = vmul.f32 -1e+09, %v293_v53 }
  0x16   : > { %303 = vadd.xlane.f32.xlu0 %v302_v4  ;;  %v2479_v57 = vrot.slane %v294_v55, %v523_v56  ;;  %v2248_v55 = vld [vmem:[%s2735_s2 + $0x10] ss:$8 sps:$4 sm:$0xff]  }
  0x2c   : > { %334 = vrot.lane.b32.xlu0 %v1935_v5, %s2344_s13 }
  0x9f   : > { %v301_v6 = vpop.xlane.xlu0 %300 }
  0xa0   : > { %v306_v7 = vmul.f32 0.03125, %v301_v6 }
  0xa2   : > { %v308_v8 = vsub.f32 %v295_v1, %v306_v7 }
  0xa3   : > { %v304_v9 = vpop.xlane.xlu0 %303 }
  0xa4   : > { %v307_v10 = vmul.f32 0.03125, %v304_v9  ;;  %v310_v11 = vmul.f32 %v308_v8, %v308_v8 }
  0xa6   : > { %v309_v12 = vsub.f32 %v296_v2, %v307_v10  ;;  %v312_v13 = vsel %vm298_vm0, %v310_v11, 0.0 }
  0xa7   : > { %313 = vadd.xlane.f32.xlu1 %v312_v13  ;;  %v335_v29 = vpop.permute.xlu0 %334 }
  0xa8   : > { %v311_v14 = vmul.f32 %v309_v12, %v309_v12 }
  0xaa   : > { %v315_v15 = vsel %vm298_vm0, %v311_v14, 0.0 }
  0xab   : > { %316 = vadd.xlane.f32.xlu1 %v315_v15 }
 0x134   : > { %v314_v18 = vpop.xlane.xlu1 %313 }
 0x135   : > { %v318_v19 = vmul.f32 0.03125, %v314_v18 }
 0x137   : > { %v320_v20 = vadd.f32 1e-12, %v318_v19 }
 0x138   : > { %v317_v21 = vpop.xlane.xlu1 %316 }
 0x139   : > { %2267 = vrsqrt.f32 %v320_v20  ;;  %v319_v22 = vmul.f32 0.03125, %v317_v21 }
 0x13b   : > { %v321_v23 = vadd.f32 1e-12, %v319_v22 }
 0x13d   : > { %2269 = vrsqrt.f32 %v321_v23 }
 0x143   : > { %v2268_v24 = vpop.eup %2267 }
 0x144   : > { %v324_v25 = vmul.f32 %v2268_v24, %v308_v8 }
 0x146   : > { %v332_v28 = vmul.f32 %v1935_v5, %v324_v25 }
 0x147   : > { %v2270_v26 = vpop.eup %2269 }
 0x148   : > { %v325_v27 = vmul.f32 %v2270_v26, %v309_v12  ;;  %v2435_v31 = vadd.f32 %v335_v29, %v332_v28 }
 0x14a   : > { %v333_v30 = vmul.f32 %v1935_v5, %v325_v27 }
 0x14c   : > { %v2437_v32 = vadd.f32 %v335_v29, %v333_v30 }
 0x14e   : > { %v339_v33 = vpack.c.bf16 %v2437_v32, %v2435_v31 }
 0x150   : > { %2068 = vmatmul.mubr.msk.bf16.vlgmr.msra.gmra.mrb[0].mxu0 %vm298_vm0, %v339_v33 }
 0x151   : > { %2079 = vmatprep.mubr.msk.bf16.mxu0 %vm2345_vm1, %v2343_v0 }
 0x223   : > { %v398_v35 = vpop.f32.mrb[0].mxu0 }
 0x224   : > { %v2069_v36 = vpop.f32.mrb[1].mxu0  ;;  %v399_v38 = vadd.f32 %v2447_v34, %v398_v35 }
 0x225   : > { %v401_v37 = vpop.f32.mrb[2].mxu0 }
 0x226   : > { %v402_v39 = vadd.f32 %v2447_v34, %v401_v37  ;;  %v2070_v40 = vpop.f32.mrb[3].mxu0 }
 0x228   : > { %v2225_v41 = vpack.i.bf16 %v402_v39, %v399_v38  ;;  %v2451_v42 = vpack.c.bf16 %v402_v39, %v399_v38 }
 0x22a   : > { %2226 = vrot.lane.b32.xlu1 %v2225_v41, %s2346_s20 }
 0x29c   : > { %v2227_v43 = vpop.permute.xlu1 %2226 }
 0x29d   : > { %v2229_v44 = vunpack.i.h.bf16 %v2227_v43  ;;  %v2228_v45 = vunpack.i.l.bf16 %v2227_v43 }
 0x29f   : > { %v2454_v46 = vpack.c.bf16 %v2229_v44, %v2228_v45 }
 0x2a1   : > { %467 = vrot.lane.b32.xlu1 %v2454_v46, %s2344_s13 }
 0x2a5   : > { %416 = vrot.lane.b32.xlu1 %v2451_v42, %s2344_s13 }
 0x313   : > { %v468_v47 = vpop.permute.xlu1 %467 }
 0x314   : > { %v473_v48 = vsel %vm418_vm2, %v468_v47, 0 }
 0x315   : > { %2078 = vmatpush3.bf16.xpose.msra.mxu0 %v473_v48 }
 0x316   : > { %2089 = vmatprep.subr.bf16.mxu0 %v2343_v0 }
 0x317   : > { %v417_v49 = vpop.permute.xlu1 %416 }
 0x318   : > { %v423_v50 = vsel %vm418_vm2, %v417_v49, 0 }
 0x319   : > { %2072 = vmatpush3.bf16.xpose.msra.mxu1 %v423_v50 }
 0x31a   : > { %2083 = vmatprep.subr.bf16.mxu1 %v2343_v0 }
 0x31c   : > { %2080 = vmatmul.mubr.msk.bf16.vlgmr.msra.gmra.mrb[4].mxu0 %vm418_vm2, %v2454_v46 }
 0x31d   : > { %2091 = vmatprep.mubr.msk.bf16.mxu0 %vm2345_vm1, %v2343_v0 }
 0x320   : > { %2074 = vmatmul.mubr.msk.bf16.vlgmr.msra.gmra.mrb[0].mxu1 %vm418_vm2, %v2451_v42 }
 0x321   : > { %2085 = vmatprep.mubr.msk.bf16.mxu1 %vm2345_vm1, %v2343_v0 }
 0x3ef   : > { %v509_v58 = vpop.f32.mrb[4].mxu0 }
 0x3f0   : > { %v518_v59 = vmul.f32 0.25, %v509_v58  ;;  %v2081_v60 = vpop.f32.mrb[5].mxu0 }
 0x3f1   : > { %v512_v61 = vpop.f32.mrb[6].mxu0 }
 0x3f2   : > { %v519_v62 = vmul.f32 0.25, %v512_v61  ;;  %v2082_v63 = vpop.f32.mrb[7].mxu0  ;;  %v528_v1 = vadd.f32 %v2479_v57, %v518_v59 }
 0x3f3   : > { %v459_v2 = vpop.f32.mrb[0].mxu1 }
 0x3f4   : > { %v516_v3 = vmul.f32 0.25, %v459_v2  ;;  %v2075_v4 = vpop.f32.mrb[1].mxu1  ;;  %v536_v5 = vsel %vm418_vm2, %v528_v1, -inf  ;;  %v529_v6 = vadd.f32 %v2479_v57, %v519_v62 }
 0x3f5   : > { %v462_v7 = vpop.f32.mrb[2].mxu1  ;;  %537 = vmax.xlane.f32.xlu0 %v536_v5 }
 0x3f6   : > { %v517_v8 = vmul.f32 0.25, %v462_v7  ;;  %v2076_v9 = vpop.f32.mrb[3].mxu1  ;;  %v539_v10 = vsel %vm418_vm2, %v529_v6, -inf  ;;  %v526_v11 = vadd.f32 %v2479_v57, %v516_v3 }
 0x3f7   : > { %540 = vmax.xlane.f32.xlu1 %v539_v10 }
 0x3f8   : > { %v530_v12 = vsel %vm418_vm2, %v526_v11, -inf  ;;  %v527_v13 = vadd.f32 %v2479_v57, %v517_v8 }
 0x3f9   : > { %531 = vmax.xlane.f32.xlu0 %v530_v12 }
 0x3fa   : > { %v533_v14 = vsel %vm418_vm2, %v527_v13, -inf }
 0x3fd   : > { %534 = vmax.xlane.f32.xlu0 %v533_v14 }
 0x482   : > { %v538_v15 = vpop.xlane.xlu0 %537 }
 0x483   : > { %v544_v16 = vsub.f32 %v528_v1, %v538_v15 }
 0x484   : > { %v541_v17 = vpop.xlane.xlu1 %540 }
 0x485   : > { %v550_v18 = vmul.f32 1.442695, %v544_v16  ;;  %v545_v19 = vsub.f32 %v529_v6, %v541_v17 }
 0x486   : > { %v532_v20 = vpop.xlane.xlu0 %531 }
 0x487   : > { %2271 = vpow2.f32 %v550_v18  ;;  %v552_v21 = vmul.f32 1.442695, %v545_v19  ;;  %v542_v22 = vsub.f32 %v526_v11, %v532_v20 }
 0x489   : > { %2273 = vpow2.f32 %v552_v21  ;;  %v546_v23 = vmul.f32 1.442695, %v542_v22  ;;  %v1948_v21 = vld [vmem:[%s2738_s5 + $0x2] ss:$0 sm:$0xff] }
 0x48a   : > { %v535_v24 = vpop.xlane.xlu0 %534 }
 0x48b   : > { %2275 = vpow2.f32 %v546_v23  ;;  %v543_v25 = vsub.f32 %v527_v13, %v535_v24 }
 0x48d   : > { %v548_v26 = vmul.f32 1.442695, %v543_v25 }
 0x48f   : > { %2277 = vpow2.f32 %v548_v26 }
 0x491   : > { %v2272_v27 = vpop.eup %2271 }
 0x492   : > { %v560_v28 = vsel %vm418_vm2, %v2272_v27, 0.0 }
 0x493   : > { %v2274_v29 = vpop.eup %2273  ;;  %561 = vadd.xlane.f32.xlu0 %v560_v28 }
 0x494   : > { %v563_v30 = vsel %vm418_vm2, %v2274_v29, 0.0 }
 0x495   : > { %v2276_v33 = vpop.eup %2275  ;;  %564 = vadd.xlane.f32.xlu1 %v563_v30  ;;  %v2249_v30 = vld [vmem:[%s2735_s2 + $0x4] ss:$8 sps:$4 sm:$0xff]  }
 0x496   : > { %v554_v35 = vsel %vm418_vm2, %v2276_v33, 0.0 }
 0x499   : > { %v2278_v36 = vpop.eup %2277  ;;  %555 = vadd.xlane.f32.xlu1 %v554_v35 }
 0x49a   : > { %v557_v37 = vsel %vm418_vm2, %v2278_v36, 0.0 }
 0x49d   : > { %558 = vadd.xlane.f32.xlu1 %v557_v37 }
 0x4a9   : > { %623 = vrot.lane.b32.xlu0 %v2454_v46, %s2347_s25 }
 0x4ad   : > { %700 = vrot.lane.b32.xlu0 %v2247_v54, %s2348_s28  ;;  %v2254_v54 = vld [vmem:[%s2736_s3 + $0x18] sm:$0xff]  }
 0x4ae   : > { %576 = vrot.lane.b32.xlu1 %v2451_v42, %s2347_s25 }
 0x4b1   : > { %702 = vrot.lane.b32.xlu0 %v2248_v55, %s2348_s28 }
 0x520   : > { %v562_v38 = vpop.xlane.xlu0 %561 }
 0x521   : > { %2279 = vrcp.f32 %v562_v38 }
 0x522   : > { %v565_v39 = vpop.xlane.xlu1 %564 }
 0x523   : > { %2281 = vrcp.f32 %v565_v39 }
 0x524   : > { %v624_v40 = vpop.permute.xlu0 %623 }
 0x525   : > { %2090 = vmatpush3.bf16.msra.mxu0 %v624_v40 }
 0x526   : > { %v556_v41 = vpop.xlane.xlu1 %555  ;;  %2103 = vmatprep.subr.bf16.mxu0 %v2343_v0 }
 0x527   : > { %2283 = vrcp.f32 %v556_v41 }
 0x528   : > { %v701_v56 = vpop.permute.xlu0 %700 }
 0x52a   : > { %v559_v43 = vpop.xlane.xlu1 %558 }
 0x52b   : > { %v2280_v44 = vpop.eup %2279  ;;  %2285 = vrcp.f32 %v559_v43 }
 0x52c   : > { %v572_v47 = vmul.f32 %v2280_v44, %v2272_v27  ;;  %v703_v58 = vpop.permute.xlu0 %702 }
 0x52d   : > { %v2282_v45 = vpop.eup %2281 }
 0x52e   : > { %v573_v48 = vmul.f32 %v2282_v45, %v2274_v29  ;;  %v577_v46 = vpop.permute.xlu1 %576 }
 0x52f   : > { %2084 = vmatpush3.bf16.msra.mxu1 %v577_v46 }
 0x530   : > { %v575_v49 = vpack.c.bf16 %v573_v48, %v572_v47  ;;  %2095 = vmatprep.subr.bf16.mxu1 %v2343_v0 }
 0x531   : > { %v2284_v42 = vpop.eup %2283 }
 0x532   : > { %2092 = vmatmul.mubr.msk.bf16.vlgmr.msra.gmra.mrb[8].mxu0 %vm418_vm2, %v575_v49  ;;  %v570_v51 = vmul.f32 %v2284_v42, %v2276_v33  ;;  %v2250_v33 = vld [vmem:[%s2735_s2 + $0x14] ss:$8 sps:$4 sm:$0xff]  }
 0x533   : > { %2107 = vmatprep.mubr.msk.bf16.mxu0 %vm2345_vm1, %v2343_v0  ;;  %2104 = vmatpush3.bf16.msra.mxu0 %v2249_v30 }
 0x534   : > { %2105 = vmatprep.subr.bf16.mxu0 %v2343_v0 }
 0x535   : > { %v2286_v50 = vpop.eup %2285 }
 0x536   : > { %v571_v52 = vmul.f32 %v2286_v50, %v2278_v36 }
 0x537   : > { %2106 = vmatpush3.bf16.msra.mxu0 %v2250_v33 }
 0x538   : > { %v574_v53 = vpack.c.bf16 %v571_v52, %v570_v51  ;;  %2123 = vmatprep.subr.bf16.mxu0 %v2343_v0  ;;  %v2251_v51 = vld [vmem:[%s2736_s3] sm:$0xff]   ;;  %v2252_v52 = vld [vmem:[%s2736_s3 + $0x8] sm:$0xff]  }
 0x53a   : > { %2086 = vmatmul.mubr.msk.bf16.vlgmr.msra.gmra.mrb[4].mxu1 %vm418_vm2, %v574_v53  ;;  %v2253_v53 = vld [vmem:[%s2736_s3 + $0x10] sm:$0xff]  }
 0x53b   : > { %2099 = vmatprep.mubr.msk.bf16.mxu1 %vm2345_vm1, %v2343_v0  ;;  %2096 = vmatpush3.bf16.msra.mxu1 %v701_v56 }
 0x53c   : > { %2097 = vmatprep.subr.bf16.mxu1 %v2343_v0 }
 0x53f   : > { %2098 = vmatpush3.bf16.msra.mxu1 %v703_v58 }
 0x540   : > { %2111 = vmatprep.subr.bf16.mxu1 %v2343_v0 }
 0x605   : > { %v663_v59 = vpop.f32.mrb[8].mxu0 }
 0x606   : > { %v2093_v60 = vpop.f32.mrb[9].mxu0 }
 0x607   : > { %v666_v61 = vpop.f32.mrb[10].mxu0 }
 0x608   : > { %v2230_v62 = vpack.i.bf16 %v666_v61, %v663_v59  ;;  %v2094_v63 = vpop.f32.mrb[11].mxu0 }
 0x60a   : > { %2231 = vrot.lane.b32.xlu1 %v2230_v62, %s2349_s8 }
 0x60d   : > { %v616_v1 = vpop.f32.mrb[4].mxu1 }
 0x60e   : > { %v2087_v2 = vpop.f32.mrb[5].mxu1  ;;  %707 = vrot.lane.b32.xlu1 %v2447_v34, %s2348_s28 }
 0x60f   : > { %v619_v3 = vpop.f32.mrb[6].mxu1 }
 0x610   : > { %v2088_v4 = vpop.f32.mrb[7].mxu1 }
 0x67c   : > { %v2232_v5 = vpop.permute.xlu1 %2231 }
 0x67d   : > { %v2234_v6 = vunpack.i.h.bf16 %v2232_v5  ;;  %v2233_v7 = vunpack.i.l.bf16 %v2232_v5 }
 0x67f   : > { %v679_v8 = vsel %vm418_vm2, %v619_v3, %v2234_v6  ;;  %v678_v9 = vsel %vm418_vm2, %v616_v1, %v2233_v7 }
 0x680   : > { %v680_v10 = vpack.c.bf16 %v679_v8, %v678_v9  ;;  %v708_v11 = vpop.permute.xlu1 %707 }
 0x682   : > { %2100 = vmatmul.mubr.msk.bf16.vlgmr.msra.gmra.mrb[8].mxu1 %vm298_vm0, %v680_v10 }
 0x683   : > { %2119 = vmatprep.mubr.msk.bf16.mxu1 %vm2345_vm1, %v2343_v0  ;;  %2112 = vmatpush3.bf16.msra.mxu1 %v2251_v51 }
 0x684   : > { %2113 = vmatprep.subr.bf16.mxu1 %v2343_v0 }
 0x687   : > { %2114 = vmatpush3.bf16.msra.mxu1 %v2252_v52 }
 0x688   : > { %2115 = vmatprep.subr.bf16.mxu1 %v2343_v0 }
 0x68b   : > { %2116 = vmatpush3.bf16.msra.mxu1 %v2253_v53 }
 0x68c   : > { %2117 = vmatprep.subr.bf16.mxu1 %v2343_v0 }
 0x68f   : > { %2118 = vmatpush3.bf16.msra.mxu1 %v2254_v54 }
 0x690   : > { %2137 = vmatprep.subr.bf16.mxu1 %v2343_v0 }
 0x755   : > { %v747_v12 = vpop.f32.mrb[8].mxu1 }
 0x756   : > { %v748_v13 = vadd.f32 %v747_v12, %v708_v11  ;;  %v2101_v14 = vpop.f32.mrb[9].mxu1 }
 0x757   : > { %v750_v34 = vpop.f32.mrb[10].mxu1 }
 0x758   : > { %v751_v15 = vadd.f32 %v750_v34, %v708_v11  ;;  %v2102_v16 = vpop.f32.mrb[11].mxu1  ;;  %v754_v17 = vadd.f32 %v748_v13, %v2435_v31 }
 0x75a   : > { %v757_v18 = vsel %vm298_vm0, %v754_v17, 0.0  ;;  %v755_v19 = vadd.f32 %v751_v15, %v2437_v32 }
 0x75b   : > { %758 = vadd.xlane.f32.xlu0 %v757_v18  ;;  %v1952_v18 = vld [vmem:[%s2738_s5 + $0x4] ss:$0 sm:$0xff] }
 0x75c   : > { %v760_v20 = vsel %vm298_vm0, %v755_v19, 0.0 }
 0x75d   : > { %761 = vadd.xlane.f32.xlu1 %v760_v20 }
 0x76e   : > { %812 = vrot.lane.b32.xlu1 %v1948_v21, %s2347_s25 }
 0x7e8   : > { %v759_v22 = vpop.xlane.xlu0 %758 }
 0x7e9   : > { %v763_v23 = vmul.f32 0.03125, %v759_v22 }
 0x7ea   : > { %v762_v24 = vpop.xlane.xlu1 %761 }
 0x7eb   : > { %v765_v25 = vsub.f32 %v754_v17, %v763_v23  ;;  %v764_v26 = vmul.f32 0.03125, %v762_v24 }
 0x7ed   : > { %v766_v31 = vsub.f32 %v755_v19, %v764_v26  ;;  %v767_v27 = vmul.f32 %v765_v25, %v765_v25 }
 0x7ee   : > { %v813_v55 = vpop.permute.xlu1 %812 }
 0x7ef   : > { %v769_v28 = vsel %vm298_vm0, %v767_v27, 0.0  ;;  %v768_v32 = vmul.f32 %v766_v31, %v766_v31 }
 0x7f0   : > { %770 = vadd.xlane.f32.xlu0 %v769_v28 }
 0x7f1   : > { %v772_v29 = vsel %vm298_vm0, %v768_v32, 0.0 }
 0x7f4   : > { %773 = vadd.xlane.f32.xlu0 %v772_v29 }
 0x80a   : > { %790 = vrot.lane.b32.xlu0 %v1948_v21, %s2344_s13 }
 0x87d   : > { %v771_v35 = vpop.xlane.xlu0 %770 }
 0x87e   : > { %v775_v36 = vmul.f32 0.03125, %v771_v35 }
 0x880   : > { %v777_v37 = vadd.f32 1e-12, %v775_v36 }
 0x881   : > { %v774_v38 = vpop.xlane.xlu0 %773 }
 0x882   : > { %2287 = vrsqrt.f32 %v777_v37  ;;  %v776_v39 = vmul.f32 0.03125, %v774_v38 }
 0x884   : > { %v778_v40 = vadd.f32 1e-12, %v776_v39 }
 0x885   : > { %v791_v48 = vpop.permute.xlu0 %790 }
 0x886   : > { %2289 = vrsqrt.f32 %v778_v40  ;;  %v2255_v40 = vld [vmem:[%s2735_s2 + $0x20] ss:$8 sps:$4 sm:$0xff]  }
 0x88c   : > { %v2288_v41 = vpop.eup %2287 }
 0x88d   : > { %v781_v43 = vmul.f32 %v2288_v41, %v765_v25  ;;  %v2256_v41 = vld [vmem:[%s2735_s2 + $0x30] ss:$8 sps:$4 sm:$0xff]  }
 0x88f   : > { %v787_v47 = vmul.f32 %v1948_v21, %v781_v43 }
 0x890   : > { %v2290_v44 = vpop.eup %2289 }
 0x891   : > { %v782_v45 = vmul.f32 %v2290_v44, %v766_v31  ;;  %v793_v49 = vadd.f32 %v791_v48, %v787_v47 }
 0x893   : > { %v788_v46 = vmul.f32 %v1948_v21, %v782_v45 }
 0x895   : > { %v794_v42 = vadd.f32 %v791_v48, %v788_v46 }
 0x897   : > { %v795_v50 = vpack.c.bf16 %v794_v42, %v793_v49 }
 0x899   : > { %2108 = vmatmul.mubr.msk.bf16.vlgmr.msra.gmra.mrb[12].mxu0 %vm298_vm0, %v795_v50 }
 0x89a   : > { %2127 = vmatprep.mubr.msk.bf16.mxu0 %vm2345_vm1, %v2343_v0  ;;  %2124 = vmatpush3.bf16.msra.mxu0 %v2255_v40 }
 0x89b   : > { %2125 = vmatprep.subr.bf16.mxu0 %v2343_v0 }
 0x89e   : > { %2126 = vmatpush3.bf16.msra.mxu0 %v2256_v41 }
 0x89f   : > { %2131 = vmatprep.subr.bf16.mxu0 %v2343_v0 }
 0x96c   : > { %v852_v56 = vpop.f32.mrb[12].mxu0 }
 0x96d   : > { %v853_v58 = vadd.f32 %v852_v56, %v813_v55  ;;  %v2109_v59 = vpop.f32.mrb[13].mxu0 }
 0x96e   : > { %v855_v60 = vpop.f32.mrb[14].mxu0 }
 0x96f   : > { %v861_v61 = vmul.f32 0.044715, %v853_v58  ;;  %v856_v62 = vadd.f32 %v855_v60, %v813_v55  ;;  %v2110_v63 = vpop.f32.mrb[15].mxu0  ;;  %v859_v13 = vmul.f32 0.5, %v853_v58  ;;  %v2593_v60 = vld [vmem:[%s2738_s5 + $0x1] ss:$0 sm:$0xff] }
 0x971   : > { %v863_v1 = vmul.f32 %v861_v61, %v853_v58  ;;  %v862_v2 = vmul.f32 0.044715, %v856_v62  ;;  %v860_v14 = vmul.f32 0.5, %v856_v62 }
 0x973   : > { %v865_v3 = vmul.f32 %v863_v1, %v853_v58  ;;  %v864_v4 = vmul.f32 %v862_v2, %v856_v62 }
 0x975   : > { %v867_v5 = vadd.f32 %v865_v3, %v853_v58  ;;  %v866_v6 = vmul.f32 %v864_v4, %v856_v62 }
 0x977   : > { %v869_v7 = vmul.f32 0.7978846, %v867_v5  ;;  %v868_v8 = vadd.f32 %v866_v6, %v856_v62 }
 0x979   : > { %2291 = vtanh.f32 %v869_v7  ;;  %v870_v9 = vmul.f32 0.7978846, %v868_v8 }
 0x97b   : > { %2293 = vtanh.f32 %v870_v9 }
 0x983   : > { %v2292_v10 = vpop.eup %2291 }
 0x984   : > { %v873_v11 = vadd.f32 1.0, %v2292_v10 }
 0x985   : > { %v2294_v12 = vpop.eup %2293 }
 0x986   : > { %v874_v34 = vadd.f32 1.0, %v2294_v12  ;;  %v875_v15 = vmul.f32 %v873_v11, %v859_v13 }
 0x988   : > { %v876_v16 = vmul.f32 %v874_v34, %v860_v14 }
 0x98a   : > { %v877_v17 = vpack.c.bf16 %v876_v16, %v875_v15 }
 0x98c   : > { %2120 = vmatmul.mubr.msk.bf16.vlgmr.msra.gmra.mrb[12].mxu1 %vm915_vm3, %v877_v17 }
 0x98d   : > { %2139 = vmatprep.mubr.msk.bf16.mxu1 %vm2345_vm1, %v2343_v0 }
 0xa5f   : > { %v953_v19 = vpop.f32.mrb[12].mxu1 }
 0xa60   : > { %v954_v20 = vadd.f32 %v1952_v18, %v953_v19  ;;  %v2121_v21 = vpop.f32.mrb[13].mxu1 }
 0xa61   : > { %v956_v22 = vpop.f32.mrb[14].mxu1 }
 0xa62   : > { %v957_v23 = vadd.f32 %v1952_v18, %v956_v22  ;;  %v2122_v24 = vpop.f32.mrb[15].mxu1  ;;  %v960_v25 = vadd.f32 %v954_v20, %v793_v49 }
 0xa64   : > { %v962_v26 = vsel %vm298_vm0, %v960_v25, 0.0  ;;  %v961_v31 = vadd.f32 %v957_v23, %v794_v42 }
 0xa65   : > { %963 = vadd.xlane.f32.xlu1 %v962_v26 }
 0xa66   : > { %v965_v27 = vsel %vm298_vm0, %v961_v31, 0.0 }
 0xa67   : > { %966 = vadd.xlane.f32.xlu0 %v965_v27 }
 0xaf2   : > { %v964_v28 = vpop.xlane.xlu1 %963 }
 0xaf3   : > { %v968_v32 = vmul.f32 0.03125, %v964_v28 }
 0xaf4   : > { %v967_v29 = vpop.xlane.xlu0 %966 }
 0xaf5   : > { %v970_v30 = vsub.f32 %v960_v25, %v968_v32  ;;  %v969_v33 = vmul.f32 0.03125, %v967_v29 }
 0xaf7   : > { %v971_v35 = vsub.f32 %v961_v31, %v969_v33  ;;  %v972_v36 = vmul.f32 %v970_v30, %v970_v30 }
 0xaf9   : > { %v974_v37 = vsel %vm298_vm0, %v972_v36, 0.0  ;;  %v973_v38 = vmul.f32 %v971_v35, %v971_v35 }
 0xafa   : > { %975 = vadd.xlane.f32.xlu0 %v974_v37 }
 0xafb   : > { %v977_v39 = vsel %vm298_vm0, %v973_v38, 0.0 }
 0xafc   : > { %978 = vadd.xlane.f32.xlu1 %v977_v39 }
 0xb0d   : > { %994 = vrot.lane.b32.xlu1 %v1952_v18, %s2347_s25 }
 0xb10   : > { %989 = vrot.lane.b32.xlu0 %v1952_v18, %s2344_s13 }
 0xb87   : > { %v976_v43 = vpop.xlane.xlu0 %975 }
 0xb88   : > { %v980_v44 = vmul.f32 0.03125, %v976_v43 }
 0xb89   : > { %v979_v45 = vpop.xlane.xlu1 %978 }
 0xb8a   : > { %v982_v47 = vadd.f32 1e-12, %v980_v44  ;;  %v981_v48 = vmul.f32 0.03125, %v979_v45 }
 0xb8b   : > { %v990_v42 = vpop.permute.xlu0 %989 }
 0xb8c   : > { %2295 = vrsqrt.f32 %v982_v47  ;;  %v983_v46 = vadd.f32 1e-12, %v981_v48 }
 0xb8d   : > { %v995_v54 = vpop.permute.xlu1 %994 }
 0xb8e   : > { %2297 = vrsqrt.f32 %v983_v46 }
 0xb96   : > { %v2296_v49 = vpop.eup %2295 }
 0xb97   : > { %v986_v50 = vmul.f32 %v2296_v49, %v970_v30 }
 0xb98   : > { %v2298_v51 = vpop.eup %2297 }
 0xb99   : > { %v987_v52 = vmul.f32 %v2298_v51, %v971_v35  ;;  %v992_v53 = vmul.f32 %v990_v42, %v986_v50 }
 0xb9b   : > { %v993_v55 = vmul.f32 %v990_v42, %v987_v52  ;;  %v2581_v56 = vadd.f32 %v995_v54, %v992_v53 }
 0xb9d   : > { %v2583_v58 = vadd.f32 %v995_v54, %v993_v55 }
 0xb9f   : > { %v999_v59 = vpack.c.bf16 %v2583_v58, %v2581_v56 }
 0xba1   : > { %2128 = vmatmul.mubr.msk.bf16.vlgmr.msra.gmra.mrb[16].mxu0 %vm298_vm0, %v999_v59 }
 0xba2   : > { %2133 = vmatprep.mubr.msk.bf16.mxu0 %vm2345_vm1, %v2343_v0 }
 0xc74   : > { %v1059_v61 = vpop.f32.mrb[16].mxu0 }
 0xc75   : > { %v2129_v62 = vpop.f32.mrb[17].mxu0  ;;  %v1060_v1 = vadd.f32 %v2593_v60, %v1059_v61 }
 0xc76   : > { %v1062_v63 = vpop.f32.mrb[18].mxu0 }
 0xc77   : > { %v1063_v2 = vadd.f32 %v2593_v60, %v1062_v63  ;;  %v2130_v3 = vpop.f32.mrb[19].mxu0 }
 0xc79   : > { %v2235_v4 = vpack.i.bf16 %v1063_v2, %v1060_v1  ;;  %v2597_v5 = vpack.c.bf16 %v1063_v2, %v1060_v1 }
 0xc7b   : > { %2236 = vrot.lane.b32.xlu1 %v2235_v4, %s2346_s20  ;;  %1077 = vrot.lane.b32.xlu0 %v2597_v5, %s2344_s13 }
 0xced   : > { %v2237_v6 = vpop.permute.xlu1 %2236  ;;  %v1078_v7 = vpop.permute.xlu0 %1077 }
 0xcee   : > { %v2239_v8 = vunpack.i.h.bf16 %v2237_v6  ;;  %v2238_v9 = vunpack.i.l.bf16 %v2237_v6  ;;  %v1083_v10 = vsel %vm418_vm2, %v1078_v7, 0 }
 0xcef   : > { %2132 = vmatpush3.bf16.xpose.msra.mxu0 %v1083_v10  ;;  %v2257_v10 = vld [vmem:[%s2735_s2 + $0x20] ss:$8 sps:$4 sm:$0xff]  }
 0xcf0   : > { %v1075_v11 = vpack.c.bf16 %v2239_v8, %v2238_v9  ;;  %2143 = vmatprep.subr.bf16.mxu0 %v2343_v0 }
 0xcf2   : > { %1127 = vrot.lane.b32.xlu1 %v1075_v11, %s2344_s13 }
 0xcf6   : > { %2134 = vmatmul.mubr.msk.bf16.vlgmr.msra.gmra.mrb[20].mxu0 %vm418_vm2, %v2597_v5 }
 0xcf7   : > { %2145 = vmatprep.mubr.msk.bf16.mxu0 %vm2345_vm1, %v2343_v0 }
 0xd64   : > { %v1128_v12 = vpop.permute.xlu1 %1127 }
 0xd65   : > { %v1133_v13 = vsel %vm418_vm2, %v1128_v12, 0 }
 0xd66   : > { %2138 = vmatpush3.bf16.xpose.msra.mxu1 %v1133_v13 }
 0xd67   : > { %2149 = vmatprep.subr.bf16.mxu1 %v2343_v0 }
 0xd6d   : > { %2140 = vmatmul.mubr.msk.bf16.vlgmr.msra.gmra.mrb[16].mxu1 %vm418_vm2, %v1075_v11 }
 0xd6e   : > { %2151 = vmatprep.mubr.msk.bf16.mxu1 %vm2345_vm1, %v2343_v0 }
 0xdc9   : > { %v1119_v14 = vpop.f32.mrb[20].mxu0 }
 0xdca   : > { %v2135_v34 = vpop.f32.mrb[21].mxu0  ;;  %v1176_v21 = vmul.f32 0.25, %v1119_v14 }
 0xdcb   : > { %v1122_v15 = vpop.f32.mrb[22].mxu0 }
 0xdcc   : > { %v2136_v16 = vpop.f32.mrb[23].mxu0  ;;  %v1177_v31 = vmul.f32 0.25, %v1122_v15  ;;  %v1180_v28 = vadd.f32 %v1176_v21, %v2479_v57 }
 0xdcd   : > { %v2258_v16 = vld [vmem:[%s2735_s2 + $0x30] ss:$8 sps:$4 sm:$0xff]  }
 0xdce   : > { %v1184_v32 = vsel %vm418_vm2, %v1180_v28, -inf  ;;  %v1181_v29 = vadd.f32 %v1177_v31, %v2479_v57  ;;  %v2652_v31 = vld [vmem:[%s2411_s10] sm:$0xff] }
 0xdd0   : > { %v1187_v30 = vsel %vm418_vm2, %v1181_v29, -inf }
 0xe40   : > { %v1169_v17 = vpop.f32.mrb[16].mxu1 }
 0xe41   : > { %v1178_v18 = vmul.f32 0.25, %v1169_v17  ;;  %v2141_v19 = vpop.f32.mrb[17].mxu1 }
 0xe42   : > { %v1172_v20 = vpop.f32.mrb[18].mxu1 }
 0xe43   : > { %v1179_v22 = vmul.f32 0.25, %v1172_v20  ;;  %v2142_v23 = vpop.f32.mrb[19].mxu1  ;;  %v1182_v24 = vadd.f32 %v1178_v18, %v2479_v57 }
 0xe45   : > { %v1190_v25 = vsel %vm418_vm2, %v1182_v24, -inf  ;;  %v1183_v26 = vadd.f32 %v1179_v22, %v2479_v57 }
 0xe46   : > { %1191 = vmax.xlane.f32.xlu1 %v1190_v25 }
 0xe47   : > { %v1193_v27 = vsel %vm418_vm2, %v1183_v26, -inf }
 0xe48   : > { %1194 = vmax.xlane.f32.xlu0 %v1193_v27 }
 0xe4c   : > { %1185 = vmax.xlane.f32.xlu0 %v1184_v32 }
 0xe50   : > { %1188 = vmax.xlane.f32.xlu0 %v1187_v30 }
 0xed3   : > { %v1192_v33 = vpop.xlane.xlu1 %1191 }
 0xed4   : > { %v1198_v35 = vsub.f32 %v1182_v24, %v1192_v33 }
 0xed5   : > { %v1195_v36 = vpop.xlane.xlu0 %1194 }
 0xed6   : > { %v1204_v37 = vmul.f32 1.442695, %v1198_v35  ;;  %v1199_v38 = vsub.f32 %v1183_v26, %v1195_v36 }
 0xed8   : > { %2299 = vpow2.f32 %v1204_v37  ;;  %v1206_v39 = vmul.f32 1.442695, %v1199_v38 }
 0xed9   : > { %v1186_v40 = vpop.xlane.xlu0 %1185 }
 0xeda   : > { %2301 = vpow2.f32 %v1206_v39  ;;  %v1196_v41 = vsub.f32 %v1180_v28, %v1186_v40  ;;  %v1978_v39 = vld [vmem:[%s2738_s5 + $0x3] ss:$0 sm:$0xff] }
 0xedc   : > { %v1200_v43 = vmul.f32 1.442695, %v1196_v41 }
 0xedd   : > { %v1189_v44 = vpop.xlane.xlu0 %1188 }
 0xede   : > { %2303 = vpow2.f32 %v1200_v43  ;;  %v1197_v45 = vsub.f32 %v1181_v29, %v1189_v44 }
 0xee0   : > { %v1202_v47 = vmul.f32 1.442695, %v1197_v45 }
 0xee2   : > { %v2300_v57 = vpop.eup %2299  ;;  %2305 = vpow2.f32 %v1202_v47 }
 0xee3   : > { %v1214_v48 = vsel %vm418_vm2, %v2300_v57, 0.0 }
 0xee4   : > { %v2302_v46 = vpop.eup %2301  ;;  %1215 = vadd.xlane.f32.xlu1 %v1214_v48 }
 0xee5   : > { %v1217_v49 = vsel %vm418_vm2, %v2302_v46, 0.0 }
 0xee6   : > { %1218 = vadd.xlane.f32.xlu0 %v1217_v49  ;;  %v2260_v49 = vld [vmem:[%s2735_s2 + $0x34] ss:$8 sps:$4 sm:$0xff]  }
 0xee8   : > { %v2304_v42 = vpop.eup %2303 }
 0xee9   : > { %v1208_v50 = vsel %vm418_vm2, %v2304_v42, 0.0 }
 0xeea   : > { %1209 = vadd.xlane.f32.xlu0 %v1208_v50 }
 0xeec   : > { %v2306_v51 = vpop.eup %2305 }
 0xeed   : > { %v1211_v52 = vsel %vm418_vm2, %v2306_v51, 0.0 }
 0xeee   : > { %1212 = vadd.xlane.f32.xlu0 %v1211_v52 }
 0xef5   : > { %1277 = vrot.lane.b32.xlu1 %v1075_v11, %s2347_s25 }
 0xef9   : > { %1354 = vrot.lane.b32.xlu1 %v2257_v10, %s2348_s28 }
 0xf04   : > { %1230 = vrot.lane.b32.xlu0 %v2597_v5, %s2347_s25 }
 0xf71   : > { %v1216_v53 = vpop.xlane.xlu1 %1215 }
 0xf72   : > { %2307 = vrcp.f32 %v1216_v53 }
 0xf73   : > { %v1219_v54 = vpop.xlane.xlu0 %1218 }
 0xf74   : > { %2309 = vrcp.f32 %v1219_v54 }
 0xf75   : > { %v1278_v55 = vpop.permute.xlu1 %1277 }
 0xf76   : > { %2150 = vmatpush3.bf16.msra.mxu1 %v1278_v55 }
 0xf77   : > { %v1210_v59 = vpop.xlane.xlu0 %1209  ;;  %2163 = vmatprep.subr.bf16.mxu1 %v2343_v0 }
 0xf78   : > { %2311 = vrcp.f32 %v1210_v59 }
 0xf79   : > { %v1355_v11 = vpop.permute.xlu1 %1354 }
 0xf7b   : > { %v1213_v61 = vpop.xlane.xlu0 %1212 }
 0xf7c   : > { %v2308_v62 = vpop.eup %2307  ;;  %2313 = vrcp.f32 %v1213_v61 }
 0xf7d   : > { %v1226_v1 = vmul.f32 %v2308_v62, %v2300_v57 }
 0xf7e   : > { %v2310_v63 = vpop.eup %2309 }
 0xf7f   : > { %v1227_v2 = vmul.f32 %v2310_v63, %v2302_v46  ;;  %v1231_v3 = vpop.permute.xlu0 %1230  ;;  %v2259_v46 = vld [vmem:[%s2735_s2 + $0x24] ss:$8 sps:$4 sm:$0xff]  }
 0xf80   : > { %2144 = vmatpush3.bf16.msra.mxu0 %v1231_v3 }
 0xf81   : > { %v1229_v4 = vpack.c.bf16 %v1227_v2, %v1226_v1  ;;  %2155 = vmatprep.subr.bf16.mxu0 %v2343_v0 }
 0xf82   : > { %v2312_v5 = vpop.eup %2311 }
 0xf83   : > { %2152 = vmatmul.mubr.msk.bf16.vlgmr.msra.gmra.mrb[20].mxu1 %vm418_vm2, %v1229_v4  ;;  %v1224_v7 = vmul.f32 %v2312_v5, %v2304_v42 }
 0xf84   : > { %2167 = vmatprep.mubr.msk.bf16.mxu1 %vm2345_vm1, %v2343_v0  ;;  %2164 = vmatpush3.bf16.msra.mxu1 %v2259_v46 }
 0xf85   : > { %2165 = vmatprep.subr.bf16.mxu1 %v2652_v31 }
 0xf86   : > { %v2314_v6 = vpop.eup %2313 }
 0xf87   : > { %v1225_v8 = vmul.f32 %v2314_v6, %v2306_v51  ;;  %v2261_v6 = vld [vmem:[%s2736_s3 + $0x20] sm:$0xff]  }
 0xf88   : > { %2166 = vmatpush3.bf16.msra.mxu1 %v2260_v49 }
 0xf89   : > { %v1228_v9 = vpack.c.bf16 %v1225_v8, %v1224_v7  ;;  %v2262_v7 = vld [vmem:[%s2736_s3 + $0x28] sm:$0xff]   ;;  %v2263_v8 = vld [vmem:[%s2736_s3 + $0x30] sm:$0xff]  }
 0xf8b   : > { %2146 = vmatmul.mubr.msk.bf16.vlgmr.msra.gmra.mrb[24].mxu0 %vm418_vm2, %v1228_v9  ;;  %v2264_v9 = vld [vmem:[%s2736_s3 + $0x38] sm:$0xff]  }
 0xf8c   : > { %2159 = vmatprep.mubr.msk.bf16.mxu0 %vm2345_vm1, %v2343_v0  ;;  %2156 = vmatpush3.bf16.msra.mxu0 %v1355_v11 }
 0xf8d   : > { %2157 = vmatprep.subr.bf16.mxu0 %v2343_v0 }
0x1056   : > { %v1317_v12 = vpop.f32.mrb[20].mxu1 }
0x1057   : > { %v2153_v13 = vpop.f32.mrb[21].mxu1 }
0x1058   : > { %v1320_v14 = vpop.f32.mrb[22].mxu1 }
0x1059   : > { %v2240_v34 = vpack.i.bf16 %v1320_v14, %v1317_v12  ;;  %v2154_v15 = vpop.f32.mrb[23].mxu1 }
0x105b   : > { %2241 = vrot.lane.b32.xlu1 %v2240_v34, %s2349_s8 }
0x105e   : > { %v1270_v17 = vpop.f32.mrb[24].mxu0 }
0x105f   : > { %1356 = vrot.lane.b32.xlu1 %v2258_v16, %s2348_s28  ;;  %v2147_v18 = vpop.f32.mrb[25].mxu0 }
0x1060   : > { %v1273_v19 = vpop.f32.mrb[26].mxu0 }
0x1061   : > { %v2148_v20 = vpop.f32.mrb[27].mxu0 }
0x1063   : > { %1361 = vrot.lane.b32.xlu1 %v2593_v60, %s2348_s28 }
0x10cd   : > { %v2242_v0 = vpop.permute.xlu1 %2241 }
0x10ce   : > { %v2244_v21 = vunpack.i.h.bf16 %v2242_v0  ;;  %v2243_v22 = vunpack.i.l.bf16 %v2242_v0 }
0x10d0   : > { %v1332_v23 = vsel %vm418_vm2, %v1270_v17, %v2243_v22  ;;  %v1333_v24 = vsel %vm418_vm2, %v1273_v19, %v2244_v21 }
0x10d1   : > { %v1334_v25 = vpack.c.bf16 %v1333_v24, %v1332_v23  ;;  %v1357_v26 = vpop.permute.xlu1 %1356 }
0x10d2   : > { %2158 = vmatpush3.bf16.msra.mxu0 %v1357_v26 }
0x10d3   : > { %2171 = vmatprep.subr.bf16.mxu0 %v2652_v31 }
0x10d5   : > { %2160 = vmatmul.mubr.msk.bf16.vlgmr.msra.gmra.mrb[28].mxu0 %vm298_vm0, %v1334_v25  ;;  %v1362_v60 = vpop.permute.xlu1 %1361 }
0x10d6   : > { %2179 = vmatprep.mubr.msk.bf16.mxu0 %vm2345_vm1, %v2652_v31  ;;  %2172 = vmatpush3.bf16.msra.mxu0 %v2261_v6 }
0x10d7   : > { %2173 = vmatprep.subr.bf16.mxu0 %v2652_v31 }
0x10da   : > { %2174 = vmatpush3.bf16.msra.mxu0 %v2262_v7 }
0x10db   : > { %2175 = vmatprep.subr.bf16.mxu0 %v2652_v31 }
0x10de   : > { %2176 = vmatpush3.bf16.msra.mxu0 %v2263_v8 }
0x10df   : > { %2177 = vmatprep.subr.bf16.mxu0 %v2652_v31 }
0x10e2   : > { %2178 = vmatpush3.bf16.msra.mxu0 %v2264_v9 }
0x10e3   : > { %2198 = vmatprep.subr.bf16.mxu0 %v2652_v31 }
0x11a8   : > { %v1401_v27 = vpop.f32.mrb[28].mxu0 }
0x11a9   : > { %v1402_v28 = vadd.f32 %v1401_v27, %v1362_v60  ;;  %v2161_v32 = vpop.f32.mrb[29].mxu0 }
0x11aa   : > { %v1404_v29 = vpop.f32.mrb[30].mxu0 }
0x11ab   : > { %v1405_v30 = vadd.f32 %v1404_v29, %v1362_v60  ;;  %v2162_v33 = vpop.f32.mrb[31].mxu0  ;;  %v1408_v35 = vadd.f32 %v1402_v28, %v2581_v56 }
0x11ad   : > { %v1411_v36 = vsel %vm298_vm0, %v1408_v35, 0.0  ;;  %v1409_v37 = vadd.f32 %v1405_v30, %v2583_v58 }
0x11ae   : > { %1412 = vadd.xlane.f32.xlu1 %v1411_v36 }
0x11af   : > { %v1414_v38 = vsel %vm298_vm0, %v1409_v37, 0.0 }
0x11b0   : > { %1415 = vadd.xlane.f32.xlu0 %v1414_v38 }
0x11bf   : > { %1444 = vrot.lane.b32.xlu1 %v1978_v39, %s2344_s13 }
0x123b   : > { %v1413_v40 = vpop.xlane.xlu1 %1412 }
0x123c   : > { %v1417_v41 = vmul.f32 0.03125, %v1413_v40 }
0x123d   : > { %v1416_v43 = vpop.xlane.xlu0 %1415 }
0x123e   : > { %v1419_v44 = vsub.f32 %v1408_v35, %v1417_v41  ;;  %v1418_v45 = vmul.f32 0.03125, %v1416_v43  ;;  %v1994_v35 = vld [vmem:[%s2738_s5 + $0x5] ss:$0 sm:$0xff] }
0x123f   : > { %v1445_v1 = vpop.permute.xlu1 %1444 }
0x1240   : > { %v1420_v56 = vsub.f32 %v1409_v37, %v1418_v45  ;;  %v1421_v47 = vmul.f32 %v1419_v44, %v1419_v44 }
0x1242   : > { %v1423_v57 = vsel %vm298_vm0, %v1421_v47, 0.0  ;;  %v1422_v58 = vmul.f32 %v1420_v56, %v1420_v56 }
0x1243   : > { %1424 = vadd.xlane.f32.xlu0 %v1423_v57 }
0x1244   : > { %v1426_v48 = vsel %vm298_vm0, %v1422_v58, 0.0 }
0x1247   : > { %1427 = vadd.xlane.f32.xlu0 %v1426_v48 }
0x125d   : > { %1466 = vrot.lane.b32.xlu0 %v1978_v39, %s2347_s25 }
0x12d0   : > { %v1425_v42 = vpop.xlane.xlu0 %1424 }
0x12d1   : > { %v1429_v50 = vmul.f32 0.03125, %v1425_v42 }
0x12d3   : > { %v1431_v51 = vadd.f32 1e-12, %v1429_v50 }
0x12d4   : > { %v1428_v52 = vpop.xlane.xlu0 %1427 }
0x12d5   : > { %2315 = vrsqrt.f32 %v1431_v51  ;;  %v1430_v53 = vmul.f32 0.03125, %v1428_v52 }
0x12d7   : > { %v1432_v54 = vadd.f32 1e-12, %v1430_v53  ;;  %v2350_v53 = vmov 0.0|0.0  }
0x12d8   : > { %v1467_v10 = vpop.permute.xlu0 %1466  ;;  %2206 = vmatprep.subr.bf16.mxu1 %v2350_v53 }
0x12d9   : > { %2317 = vrsqrt.f32 %v1432_v54  ;;  %v2334_v54 = vld [vmem:[%s2476_s23] sm:$0x1] }
0x12df   : > { %v2316_v55 = vpop.eup %2315 }
0x12e0   : > { %v1435_v59 = vmul.f32 %v2316_v55, %v1419_v44  ;;  %v1727_v55 = vsel %vm1726_vm4, %v2334_v54, 0.0 }
0x12e2   : > { %v1441_v63 = vmul.f32 %v1978_v39, %v1435_v59  ;;  %v2265_v59 = vld [vmem:[%s2737_s4] sm:$0xff]  }
0x12e3   : > { %v2318_v61 = vpop.eup %2317 }
0x12e4   : > { %v1436_v62 = vmul.f32 %v2318_v61, %v1420_v56  ;;  %v1447_v3 = vadd.f32 %v1445_v1, %v1441_v63 }
0x12e6   : > { %v1442_v2 = vmul.f32 %v1978_v39, %v1436_v62 }
0x12e8   : > { %v1448_v4 = vadd.f32 %v1445_v1, %v1442_v2 }
0x12ea   : > { %v1449_v5 = vpack.c.bf16 %v1448_v4, %v1447_v3 }
0x12ec   : > { %2168 = vmatmul.mubr.msk.bf16.vlgmr.msra.gmra.mrb[24].mxu1 %vm298_vm0, %v1449_v5 }
0x12ed   : > { %2187 = vmatprep.mubr.msk.f32.mxu1 %vm2345_vm1, %v2652_v31 }
0x13bf   : > { %v1506_v11 = vpop.f32.mrb[24].mxu1 }
0x13c0   : > { %v1507_v12 = vadd.f32 %v1506_v11, %v1467_v10  ;;  %v2169_v13 = vpop.f32.mrb[25].mxu1 }
0x13c1   : > { %v1509_v14 = vpop.f32.mrb[26].mxu1 }
0x13c2   : > { %v1515_v34 = vmul.f32 0.044715, %v1507_v12  ;;  %v1510_v15 = vadd.f32 %v1509_v14, %v1467_v10  ;;  %v2170_v16 = vpop.f32.mrb[27].mxu1  ;;  %v1513_v27 = vmul.f32 0.5, %v1507_v12 }
0x13c4   : > { %v1517_v17 = vmul.f32 %v1515_v34, %v1507_v12  ;;  %v1516_v18 = vmul.f32 0.044715, %v1510_v15  ;;  %v1514_v28 = vmul.f32 0.5, %v1510_v15  ;;  %v2266_v34 = vld [vmem:[%s2737_s4 + $0x8] sm:$0xff]  }
0x13c6   : > { %v1519_v19 = vmul.f32 %v1517_v17, %v1507_v12  ;;  %v1518_v20 = vmul.f32 %v1516_v18, %v1510_v15 }
0x13c8   : > { %v1521_v0 = vadd.f32 %v1519_v19, %v1507_v12  ;;  %v1520_v21 = vmul.f32 %v1518_v20, %v1510_v15 }
0x13ca   : > { %v1523_v22 = vmul.f32 0.7978846, %v1521_v0  ;;  %v1522_v23 = vadd.f32 %v1520_v21, %v1510_v15  ;;  %v2003_v15 = vld [vmem:[%s2739_s6] ss:$0 sm:$0xff] }
0x13cc   : > { %2319 = vtanh.f32 %v1523_v22  ;;  %v1524_v24 = vmul.f32 0.7978846, %v1522_v23 }
0x13ce   : > { %2321 = vtanh.f32 %v1524_v24 }
0x13d6   : > { %v2320_v25 = vpop.eup %2319 }
0x13d7   : > { %v1527_v26 = vadd.f32 1.0, %v2320_v25 }
0x13d8   : > { %v2322_v60 = vpop.eup %2321 }
0x13d9   : > { %v1528_v32 = vadd.f32 1.0, %v2322_v60  ;;  %v1529_v29 = vmul.f32 %v1527_v26, %v1513_v27 }
0x13db   : > { %v1530_v30 = vmul.f32 %v1528_v32, %v1514_v28 }
0x13dd   : > { %v1531_v33 = vpack.c.bf16 %v1530_v30, %v1529_v29 }
0x13df   : > { %2180 = vmatmul.mubr.msk.bf16.vlgmr.msra.gmra.mrb[32].mxu0 %vm915_vm3, %v1531_v33 }
0x13e0   : > { %2202 = vmatprep.mubr.msk.bf16.mxu0 %vm2345_vm1, %v2652_v31 }
0x14b2   : > { %v1607_v36 = vpop.f32.mrb[32].mxu0 }
0x14b3   : > { %v1608_v37 = vadd.f32 %v1994_v35, %v1607_v36  ;;  %v2181_v38 = vpop.f32.mrb[33].mxu0 }
0x14b4   : > { %v1610_v39 = vpop.f32.mrb[34].mxu0 }
0x14b5   : > { %v1611_v40 = vadd.f32 %v1994_v35, %v1610_v39  ;;  %v2182_v41 = vpop.f32.mrb[35].mxu0  ;;  %v1614_v43 = vadd.f32 %v1608_v37, %v1447_v3 }
0x14b7   : > { %v1616_v44 = vsel %vm298_vm0, %v1614_v43, 0.0  ;;  %v1615_v45 = vadd.f32 %v1611_v40, %v1448_v4 }
0x14b8   : > { %1617 = vadd.xlane.f32.xlu1 %v1616_v44 }
0x14b9   : > { %v1619_v56 = vsel %vm298_vm0, %v1615_v45, 0.0 }
0x14ba   : > { %1620 = vadd.xlane.f32.xlu0 %v1619_v56 }
0x1545   : > { %v1618_v47 = vpop.xlane.xlu1 %1617 }
0x1546   : > { %v1622_v57 = vmul.f32 0.03125, %v1618_v47 }
0x1547   : > { %v1621_v58 = vpop.xlane.xlu0 %1620 }
0x1548   : > { %v1624_v48 = vsub.f32 %v1614_v43, %v1622_v57  ;;  %v1623_v46 = vmul.f32 0.03125, %v1621_v58 }
0x154a   : > { %v1625_v49 = vsub.f32 %v1615_v45, %v1623_v46  ;;  %v1626_v42 = vmul.f32 %v1624_v48, %v1624_v48 }
0x154c   : > { %v1628_v50 = vsel %vm298_vm0, %v1626_v42, 0.0  ;;  %v1627_v51 = vmul.f32 %v1625_v49, %v1625_v49 }
0x154d   : > { %1629 = vadd.xlane.f32.xlu1 %v1628_v50 }
0x154e   : > { %v1631_v52 = vsel %vm298_vm0, %v1627_v51, 0.0 }
0x154f   : > { %1632 = vadd.xlane.f32.xlu0 %v1631_v52 }
0x155e   : > { %1643 = vrot.lane.b32.xlu1 %v1994_v35, %s2344_s13 }
0x1565   : > { %1648 = vrot.lane.b32.xlu0 %v1994_v35, %s2347_s25 }
0x1569   : > { %1804 = vrot.lane.b32.xlu0 %v2265_v59, %s2344_s13 }
0x156d   : > { %1756 = vrot.lane.b32.xlu0 %v2003_v15, %s2347_s25 }
0x1571   : > { %1806 = vrot.lane.b32.xlu0 %v2266_v34, %s2344_s13 }
0x1575   : > { %1810 = vrot.lane.b32.xlu0 %v2003_v15, %s2348_s28 }
0x1582   : > { %1728 = vadd.xlane.f32.xlu1 %v1727_v55 }
0x15da   : > { %v1630_v61 = vpop.xlane.xlu1 %1629 }
0x15db   : > { %v1634_v62 = vmul.f32 0.03125, %v1630_v61 }
0x15dc   : > { %v1633_v63 = vpop.xlane.xlu0 %1632 }
0x15dd   : > { %v1636_v1 = vadd.f32 1e-12, %v1634_v62  ;;  %v1635_v2 = vmul.f32 0.03125, %v1633_v63 }
0x15de   : > { %v1644_v5 = vpop.permute.xlu1 %1643 }
0x15df   : > { %2323 = vrsqrt.f32 %v1636_v1  ;;  %v1637_v3 = vadd.f32 1e-12, %v1635_v2 }
0x15e0   : > { %v1649_v10 = vpop.permute.xlu0 %1648 }
0x15e1   : > { %2325 = vrsqrt.f32 %v1637_v3 }
0x15e4   : > { %v1805_v16 = vpop.permute.xlu0 %1804 }
0x15e5   : > { %2199 = vmatpush3.bf16.msra.mxu0 %v1805_v16 }
0x15e6   : > { %2200 = vmatprep.subr.bf16.mxu0 %v2652_v31 }
0x15e8   : > { %v1757_v23 = vpop.permute.xlu0 %1756 }
0x15e9   : > { %v2324_v4 = vpop.eup %2323 }
0x15ea   : > { %v1640_v6 = vmul.f32 %v2324_v4, %v1624_v48 }
0x15eb   : > { %v2326_v7 = vpop.eup %2325 }
0x15ec   : > { %v1641_v8 = vmul.f32 %v2326_v7, %v1625_v49  ;;  %v1646_v9 = vmul.f32 %v1644_v5, %v1640_v6  ;;  %v1807_v24 = vpop.permute.xlu0 %1806 }
0x15ed   : > { %2201 = vmatpush3.bf16.msra.mxu0 %v1807_v24 }
0x15ee   : > { %v1647_v11 = vmul.f32 %v1644_v5, %v1641_v8  ;;  %v1651_v12 = vadd.f32 %v1649_v10, %v1646_v9 }
0x15f0   : > { %v1652_v13 = vadd.f32 %v1649_v10, %v1647_v11  ;;  %v1811_v29 = vpop.permute.xlu0 %1810 }
0x15f2   : > { %v2207_v14 = vpack.c.bf16 %v1652_v13, %v1651_v12 }
0x15f4   : > { %2208 = vmatpush3.bf16.msra.mxu1 %v2207_v14 }
0x15f5   : > { %2190 = vmatprep.subr.bf16.mxu1 %v2652_v31 }
0x15f7   : > { %2188 = vmatmul.mubr.msk.f32.vlgmr.msra.gmra.mrb[28].mxu1 %vm418_vm2, %v2334_v54 }
0x15f8   : > { %2191 = vmatpush3.bf16.msra.mxu1 %v2265_v59  ;;  %2194 = vmatprep.mubr.msk.bf16.mxu1 %vm2345_vm1, %v2652_v31 }
0x15f9   : > { %2192 = vmatprep.subr.bf16.mxu1 %v2652_v31 }
0x15fc   : > { %2193 = vmatpush3.bf16.msra.mxu1 %v2266_v34 }
0x160f   : > { %v1729_v17 = vpop.xlane.xlu1 %1728 }
0x1610   : > { %v1730_v18 = vmax.f32 %v1729_v17, 1.0 }
0x1612   : > { %2327 = vrcp.f32 %v1730_v18 }
0x161c   : > { %v2328_v19 = vpop.eup %2327 }
0x16ca   : > { %v1722_v20 = vpop.f32.mrb[28].mxu1 }
0x16cb   : > { %v1732_v0 = vmul.f32 %v2328_v19, %v1722_v20  ;;  %v2189_v21 = vpop.f32.mrb[29].mxu1 }
0x16cd   : > { %v1733_v22 = vpack.c.bf16 %v1732_v0, %v1732_v0 }
0x16cf   : > { %2195 = vmatmul.mubr.msk.bf16.vlgmr.msra.gmra.mrb[32].mxu1 %vm298_vm0, %v1733_v22 }
0x17a2   : > { %v1796_v25 = vpop.f32.mrb[32].mxu1 }
0x17a3   : > { %v1797_v26 = vadd.f32 %v1796_v25, %v1757_v23  ;;  %v2196_v31 = vpop.f32.mrb[33].mxu1 }
0x17a4   : > { %v1799_v60 = vpop.f32.mrb[34].mxu1 }
0x17a5   : > { %v1802_v27 = vmax.f32 %v1797_v26, 0.0  ;;  %v2197_v28 = vpop.f32.mrb[35].mxu1 }
0x17a7   : > { %v1803_v32 = vpack.c.bf16 %v1802_v27, %v1802_v27 }
0x17a9   : > { %2203 = vmatmul.mubr.msk.bf16.vlgmr.msra.gmra.mrb[36].mxu0 %vm298_vm0, %v1803_v32 }
0x187c   : > { %v1850_v30 = vpop.f32.mrb[36].mxu0 }
0x187d   : > { %v2204_v33 = vpop.f32.mrb[37].mxu0  ;;  %v1851_v35 = vadd.f32 %v1850_v30, %v1811_v29 }
0x187e   : > { %v1853_v36 = vpop.f32.mrb[38].mxu0 }
0x187f   : > { %v2006_v37 = vmul.f32 -1.442695, %v1851_v35  ;;  %v2205_v38 = vpop.f32.mrb[39].mxu0 }
0x1881   : > { %2329 = vpow2.f32 %v2006_v37 }
0x188b   : > { %v2330_v39 = vpop.eup %2329 }
0x188c   : > { %v1859_v40 = vadd.f32 1.0, %v2330_v39 }
0x188e   : > { %2331 = vrcp.f32 %v1859_v40 }
0x1898   : > { %v2332_v41 = vpop.eup %2331 }
0x1899   : > { %1864 = vst.msk [vmem:[%s2411_s10] sm:$0x1] %vm1863_vm5, %v2332_v41 }
0x189a PF: > { %s17_s24 = sadd.s32 1, %s2341_s24  }
0x189b   : > { %p14_p4 = scmp.ge.s32.totalorder %s17_s24, 4  }
0x189d   :  { %16 = sbr.rel (!%p14_p4) target bundleno = 1 (0x1), region = 83 }

</bundles_post_ra>
